<compile_context>
chip_gen: v7x
topology: tpu7x:2x2x1
jax: 0.10.0
libtpu: 0.0.40
codegen_flags: <defaults>
</compile_context>

<pallas_src>
import functools

import jax
import jax.numpy as jnp
from jax.experimental import pallas as pl
from jax.experimental.pallas import tpu as pltpu


def _sigmoid(z):
    # Exact sigmoid kept so the 1e-5 correctness check stays tight.
    # (pl.reciprocal(..., approx=True) would move the divide to the EUP but
    #  loosens accuracy to ~2^-12.)
    return 1.0 / (1.0 + jnp.exp(-z))


# ---------------------------------------------------------------------------
# Fused kernel: RCAB chain + tail 3x3 conv + group PixelAttention + Balance.
# Block views:
#   x_ref    : (C, TH*W)        original input rows of this tile (flattened)
#   halo_ref : (C, 2*W)         [top halo row | bottom halo row] of raw x
#   rw_ref   : (R, C, C)        per-RCAB 1x1 PA weights  [r, out, in]
#   rb_ref   : (R, C, 1)        per-RCAB 1x1 PA biases
#   cw_ref   : (9, C, C)        tail 3x3 conv weights    [dy*3+dx, out, in]
#   cb_ref   : (C, 1)           tail conv bias
#   gw_ref   : (C, C)           group PA 1x1 weights
#   gb_ref   : (C, 1)           group PA bias
#   s_ref    : SMEM (3R+1,)     [bs_0, as_0, bal_0, ..., group_balance]
#   out_ref  : (C, TH*W)
#   ext_ref  : VMEM (C, (TH+4)*W) scratch: [zeros|top|center|bottom|zeros]
# ---------------------------------------------------------------------------
def _group_kernel(x_ref, halo_ref, rw_ref, rb_ref, cw_ref, cb_ref,
                  gw_ref, gb_ref, s_ref, out_ref, ext_ref, *, TH, W, R):
    f32 = jnp.float32
    C = x_ref.shape[0]
    THW = TH * W

    def mix(w, v, b=None):
        # out[o, :] = sum_i w[o, i] * v[i, :] (+ b[o]) — C broadcast VPU FMAs.
        acc = jnp.zeros((w.shape[0], v.shape[1]), f32)
        for i in range(w.shape[1]):
            acc = acc + w[:, i:i + 1] * v[i:i + 1, :]
        return acc if b is None else acc + b

    def rcab_chain(v):
        # Per-pixel: PA(x)=x*sigmoid(W x + b); res = bs*x - as*PA(x); Balance(res, x).
        for r in range(R):
            w = rw_ref[r].astype(f32)
            b = rb_ref[r].astype(f32)
            pa = v * _sigmoid(mix(w, v, b))
            bs = s_ref[3 * r + 0]
            asc = s_ref[3 * r + 1]
            bal = s_ref[3 * r + 2]
            v = bal * (bs * v - asc * pa) + (1.0 - bal) * v
        return v

    x_c = x_ref[...].astype(f32)            # (C, THW)  original x (needed for Balance)
    halo = halo_ref[...].astype(f32)        # (C, 2W)   raw x halo rows (zeros at borders)

    h_c = rcab_chain(x_c)                   # RCAB chain on the center tile
    h_halo = rcab_chain(halo)               # ... and (redundantly, cheap) on halo rows
                                            # note rcab_chain(0) == 0, so border zeros stay zero.

    # Assemble zero-guarded, row-extended flat buffer for the 3x3 conv taps.
    zrow = jnp.zeros((C, W), f32)
    ext_ref[:, 0:W] = zrow                            # left guard row
    ext_ref[:, W:2 * W] = h_halo[:, :W]               # top halo row
    ext_ref[:, 2 * W:2 * W + THW] = h_c               # center rows
    ext_ref[:, 2 * W + THW:3 * W + THW] = h_halo[:, W:]   # bottom halo row
    ext_ref[:, 3 * W + THW:4 * W + THW] = zrow        # right guard row

    # Tail 3x3 conv: 9 static lane-offset slices of the extended buffer,
    # column padding handled by lane masks (row padding by the halo rows).
    col = jax.lax.broadcasted_iota(jnp.int32, (1, THW), 1) % W
    acc = jnp.zeros((C, THW), f32)
    for k in range(9):
        dy, dx = k // 3, k % 3
        shift = (dy - 1) * W + (dx - 1)
        tap = ext_ref[:, 2 * W + shift: 2 * W + shift + THW]      # (C, THW)
        if dx == 0:
            tap = jnp.where(col != 0, tap, 0.0)        # reads column -1 -> zero
        elif dx == 2:
            tap = jnp.where(col != W - 1, tap, 0.0)    # reads column W  -> zero
        acc = acc + mix(cw_ref[k].astype(f32), tap)
    acc = acc + cb_ref[...].astype(f32)

    # Group tail: res = h * PA(h);  out = Balance(res, x).
    att = _sigmoid(mix(gw_ref[...].astype(f32), acc, gb_ref[...].astype(f32)))
    res = acc * (acc * att)
    g_bal = s_ref[3 * R]
    out = g_bal * res + (1.0 - g_bal) * x_c
    out_ref[...] = out.astype(out_ref.dtype)


def _pick_row_tile(H, W, C, max_tile_bytes=2 << 20, min_row_tiles=2):
    """Largest row tile TH s.t. TH divides H, the flattened tile is lane-aligned
    (TH*W % 128 == 0, or TH == H), and the tile stays small enough for VMEM on
    all chips (incl. v7x's 64 MiB / 32 MiB scoped default)."""
    cands = [th for th in range(1, H + 1)
             if H % th == 0 and ((th * W) % 128 == 0 or th == H)]
    fit = [th for th in cands if th * W * C * 4 <= max_tile_bytes]
    pref = [th for th in fit if (H // th) >= min_row_tiles]
    if pref:
        return max(pref)
    if fit:
        return max(fit)
    return min(cands)


def residual_group_forward(x, params, *, row_tile=None):
    """x: (N, C, H, W) NCHW (PyTorch layout)."""
    N, C, H, W = x.shape
    TH = row_tile if row_tile is not None else _pick_row_tile(H, W, C)
    assert H % TH == 0
    nt = H // TH
    THW = TH * W
    R = params["rcab_w"].shape[0]
    dtype = x.dtype

    # Halo rows of raw x per tile (RCAB is per-pixel, so the kernel re-derives h
    # on them); zero rows at the image top/bottom give the conv's zero padding.
    zero_row = jnp.zeros((N, C, 1, W), dtype)
    if nt > 1:
        tops = jnp.concatenate([zero_row, x[:, :, TH - 1:H - 1:TH, :]], axis=2)  # (N,C,nt,W)
        bots = jnp.concatenate([x[:, :, TH::TH, :], zero_row], axis=2)           # (N,C,nt,W)
    else:
        tops, bots = zero_row, zero_row
    halos = jnp.transpose(jnp.concatenate([tops, bots], axis=-1), (0, 2, 1, 3))  # (N,nt,C,2W)

    x_flat = x.reshape(N, C, H * W)   # contiguous reshape; spatial goes to lanes

    kernel = functools.partial(_group_kernel, TH=TH, W=W, R=R)

    out_flat = pl.pallas_call(
        kernel,
        out_shape=jax.ShapeDtypeStruct((N, C, H * W), dtype),
        grid=(N, nt),
        in_specs=[
            pl.BlockSpec((None, C, THW), lambda n, t: (n, 0, t)),          # x tile
            pl.BlockSpec((None, None, C, 2 * W), lambda n, t: (n, t, 0, 0)),  # halo rows
            pl.BlockSpec((R, C, C), lambda n, t: (0, 0, 0)),               # RCAB 1x1 w
            pl.BlockSpec((R, C, 1), lambda n, t: (0, 0, 0)),               # RCAB 1x1 b
            pl.BlockSpec((9, C, C), lambda n, t: (0, 0, 0)),               # tail conv w
            pl.BlockSpec((C, 1), lambda n, t: (0, 0)),                     # tail conv b
            pl.BlockSpec((C, C), lambda n, t: (0, 0)),                     # group PA w
            pl.BlockSpec((C, 1), lambda n, t: (0, 0)),                     # group PA b
            pl.BlockSpec(memory_space=pltpu.MemorySpace.SMEM),             # scalars
        ],
        out_specs=pl.BlockSpec((None, C, THW), lambda n, t: (n, 0, t)),
        scratch_shapes=[pltpu.VMEM((C, (TH + 4) * W), jnp.float32)],
        compiler_params=pltpu.CompilerParams(
            dimension_semantics=("parallel", "parallel")),
    )(x_flat, halos, params["rcab_w"], params["rcab_b"], params["conv_w"],
      params["conv_b"], params["gpa_w"], params["gpa_b"], params["scalars"])

    return out_flat.reshape(N, C, H, W)


# ---------------------------------------------------------------------------
# Pure-JAX reference (correctness check only).
# ---------------------------------------------------------------------------
def residual_group_reference(x, params):
    N, C, H, W = x.shape
    s = params["scalars"]
    R = params["rcab_w"].shape[0]
    h = x.astype(jnp.float32)
    for r in range(R):
        w = params["rcab_w"][r]
        b = params["rcab_b"][r][:, 0]
        z = jnp.einsum("oi,nihw->nohw", w, h) + b[None, :, None, None]
        pa = h * _sigmoid(z)
        bs, asc, bal = s[3 * r], s[3 * r + 1], s[3 * r + 2]
        h = bal * (bs * h - asc * pa) + (1.0 - bal) * h
    hp = jnp.pad(h, ((0, 0), (0, 0), (1, 1), (1, 1)))
    conv = jnp.zeros_like(h)
    for dy in range(3):
        for dx in range(3):
            conv = conv + jnp.einsum("oi,nihw->nohw", params["conv_w"][dy * 3 + dx],
                                     hp[:, :, dy:dy + H, dx:dx + W])
    conv = conv + params["conv_b"][:, 0][None, :, None, None]
    z = jnp.einsum("oi,nihw->nohw", params["gpa_w"], conv) \
        + params["gpa_b"][:, 0][None, :, None, None]
    res = conv * (conv * _sigmoid(z))
    g_bal = s[3 * R]
    return (g_bal * res + (1.0 - g_bal) * x.astype(jnp.float32)).astype(x.dtype)


def init_params(key, n_feat, n_resblocks):
    C, R = n_feat, n_resblocks
    ks = jax.random.split(key, 6)
    params = {
        # Per-RCAB PixelAttention 1x1 conv, [r, out, in] (PyTorch (Cout,Cin,1,1)).
        "rcab_w": jax.random.normal(ks[0], (R, C, C), jnp.float32) * 0.1,
        "rcab_b": jax.random.normal(ks[1], (R, C, 1), jnp.float32) * 0.1,
        # Tail 3x3 conv, [dy*3+dx, out, in] (PyTorch (Cout,Cin,ky,kx)).
        "conv_w": jax.random.normal(ks[2], (9, C, C), jnp.float32) * 0.1,
        "conv_b": jax.random.normal(ks[3], (C, 1), jnp.float32) * 0.1,
        # Group PixelAttention 1x1 conv.
        "gpa_w": jax.random.normal(ks[4], (C, C), jnp.float32) * 0.1,
        "gpa_b": jax.random.normal(ks[5], (C, 1), jnp.float32) * 0.1,
    }
    scal = []
    for r in range(R):
        scal += [1.0 + 0.05 * r, 0.9 - 0.05 * r, 0.6]   # body_scale, attn_scale, balance
    scal += [0.55]                                       # group balance
    params["scalars"] = jnp.array(scal, jnp.float32)
    return params


if __name__ == "__main__":
    N, C, H, W = 2, 4, 16, 16          # batch, n_feat, spatial (NCHW like PyTorch)
    n_resblocks = 2
    key = jax.random.PRNGKey(0)
    kx, kp = jax.random.split(key)

    x = jax.random.normal(kx, (N, C, H, W), jnp.float32)
    params = init_params(kp, n_feat=C, n_resblocks=n_resblocks)

    out = residual_group_forward(x, params)
    out = jax.block_until_ready(out)

    ref = residual_group_reference(x, params)
    assert out.shape == (N, C, H, W)
    assert bool(jnp.allclose(out, ref, atol=1e-5, rtol=1e-5)), "mismatch vs reference"

    print("KERNEL_OK")
</pallas_src>

<mosaic_0001>
module attributes {stable_mosaic.version = 11 : i64} {
  func.func @_group_kernel(%arg0: i32, %arg1: i32, %arg2: memref<1x4x128xf32, #tpu.memory_space<vmem>>, %arg3: memref<1x1x4x32xf32, #tpu.memory_space<vmem>>, %arg4: memref<2x4x4xf32, #tpu.memory_space<vmem>>, %arg5: memref<2x4x1xf32, #tpu.memory_space<vmem>>, %arg6: memref<9x4x4xf32, #tpu.memory_space<vmem>>, %arg7: memref<4x1xf32, #tpu.memory_space<vmem>>, %arg8: memref<4x4xf32, #tpu.memory_space<vmem>>, %arg9: memref<4x1xf32, #tpu.memory_space<vmem>>, %arg10: memref<7xf32, #tpu.memory_space<smem>>, %arg11: memref<1x4x128xf32, #tpu.memory_space<vmem>>, %arg12: memref<4x192xf32, #tpu.memory_space<vmem>>) attributes {dimension_semantics = [#tpu.dimension_semantics<parallel>, #tpu.dimension_semantics<parallel>], iteration_bounds = array<i64: 2, 2>, scalar_prefetch = 0 : i64, scratch_operands = 1 : i64, tpu.core_type = #tpu.core_type<tc>, window_params = [{transform_indices = @transform_0, window_bounds = array<i64: 1, 4, 128>}, {transform_indices = @transform_1, window_bounds = array<i64: 1, 1, 4, 32>}, {pipeline_mode = #tpu.pipeline_mode<synchronous>, transform_indices = @transform_2, window_bounds = array<i64: 2, 4, 4>}, {pipeline_mode = #tpu.pipeline_mode<synchronous>, transform_indices = @transform_3, window_bounds = array<i64: 2, 4, 1>}, {pipeline_mode = #tpu.pipeline_mode<synchronous>, transform_indices = @transform_4, window_bounds = array<i64: 9, 4, 4>}, {pipeline_mode = #tpu.pipeline_mode<synchronous>, transform_indices = @transform_5, window_bounds = array<i64: 4, 1>}, {pipeline_mode = #tpu.pipeline_mode<synchronous>, transform_indices = @transform_6, window_bounds = array<i64: 4, 4>}, {pipeline_mode = #tpu.pipeline_mode<synchronous>, transform_indices = @transform_7, window_bounds = array<i64: 4, 1>}, {transform_indices = @transform_8, window_bounds = array<i64: 7>}, {transform_indices = @transform_9, window_bounds = array<i64: 1, 4, 128>}]} {
    %c0 = arith.constant 0 : index
    %c0_0 = arith.constant 0 : index
    %c0_1 = arith.constant 0 : index
    %0 = vector.load %arg2[%c0, %c0_0, %c0_1] : memref<1x4x128xf32, #tpu.memory_space<vmem>>, vector<1x4x128xf32>
    %1 = vector.shape_cast %0 : vector<1x4x128xf32> to vector<4x128xf32>
    %c0_2 = arith.constant 0 : index
    %c0_3 = arith.constant 0 : index
    %c0_4 = arith.constant 0 : index
    %c0_5 = arith.constant 0 : index
    %2 = vector.load %arg3[%c0_2, %c0_3, %c0_4, %c0_5] : memref<1x1x4x32xf32, #tpu.memory_space<vmem>>, vector<1x1x4x32xf32>
    %3 = vector.shape_cast %2 : vector<1x1x4x32xf32> to vector<4x32xf32>
    %c0_6 = arith.constant 0 : index
    %c0_7 = arith.constant 0 : index
    %c0_8 = arith.constant 0 : index
    %4 = vector.load %arg4[%c0_6, %c0_7, %c0_8] : memref<2x4x4xf32, #tpu.memory_space<vmem>>, vector<1x4x4xf32>
    %5 = vector.shape_cast %4 : vector<1x4x4xf32> to vector<4x4xf32>
    %c0_9 = arith.constant 0 : index
    %c0_10 = arith.constant 0 : index
    %c0_11 = arith.constant 0 : index
    %6 = vector.load %arg5[%c0_9, %c0_10, %c0_11] : memref<2x4x1xf32, #tpu.memory_space<vmem>>, vector<1x4x1xf32>
    %7 = vector.shape_cast %6 : vector<1x4x1xf32> to vector<4x1xf32>
    %cst = arith.constant 0.000000e+00 : f32
    %8 = vector.broadcast %cst : f32 to vector<4x128xf32>
    %9 = vector.extract_strided_slice %5 {offsets = [0, 0], sizes = [4, 1], strides = [1, 1]} : vector<4x4xf32> to vector<4x1xf32>
    %10 = vector.extract_strided_slice %1 {offsets = [0, 0], sizes = [1, 128], strides = [1, 1]} : vector<4x128xf32> to vector<1x128xf32>
    %11 = vector.broadcast %9 : vector<4x1xf32> to vector<4x128xf32>
    %12 = vector.broadcast %10 : vector<1x128xf32> to vector<4x128xf32>
    %13 = arith.mulf %11, %12 : vector<4x128xf32>
    %14 = arith.addf %8, %13 : vector<4x128xf32>
    %15 = vector.extract_strided_slice %5 {offsets = [0, 1], sizes = [4, 1], strides = [1, 1]} : vector<4x4xf32> to vector<4x1xf32>
    %16 = vector.extract_strided_slice %1 {offsets = [1, 0], sizes = [1, 128], strides = [1, 1]} : vector<4x128xf32> to vector<1x128xf32>
    %17 = vector.broadcast %15 : vector<4x1xf32> to vector<4x128xf32>
    %18 = vector.broadcast %16 : vector<1x128xf32> to vector<4x128xf32>
    %19 = arith.mulf %17, %18 : vector<4x128xf32>
    %20 = arith.addf %14, %19 : vector<4x128xf32>
    %21 = vector.extract_strided_slice %5 {offsets = [0, 2], sizes = [4, 1], strides = [1, 1]} : vector<4x4xf32> to vector<4x1xf32>
    %22 = vector.extract_strided_slice %1 {offsets = [2, 0], sizes = [1, 128], strides = [1, 1]} : vector<4x128xf32> to vector<1x128xf32>
    %23 = vector.broadcast %21 : vector<4x1xf32> to vector<4x128xf32>
    %24 = vector.broadcast %22 : vector<1x128xf32> to vector<4x128xf32>
    %25 = arith.mulf %23, %24 : vector<4x128xf32>
    %26 = arith.addf %20, %25 : vector<4x128xf32>
    %27 = vector.extract_strided_slice %5 {offsets = [0, 3], sizes = [4, 1], strides = [1, 1]} : vector<4x4xf32> to vector<4x1xf32>
    %28 = vector.extract_strided_slice %1 {offsets = [3, 0], sizes = [1, 128], strides = [1, 1]} : vector<4x128xf32> to vector<1x128xf32>
    %29 = vector.broadcast %27 : vector<4x1xf32> to vector<4x128xf32>
    %30 = vector.broadcast %28 : vector<1x128xf32> to vector<4x128xf32>
    %31 = arith.mulf %29, %30 : vector<4x128xf32>
    %32 = arith.addf %26, %31 : vector<4x128xf32>
    %33 = vector.broadcast %7 : vector<4x1xf32> to vector<4x128xf32>
    %34 = arith.addf %32, %33 : vector<4x128xf32>
    %cst_12 = arith.constant 0.000000e+00 : f32
    %35 = vector.broadcast %cst_12 : f32 to vector<4x128xf32>
    %36 = arith.subf %35, %34 : vector<4x128xf32>
    %37 = math.exp %36 : vector<4x128xf32>
    %cst_13 = arith.constant 1.000000e+00 : f32
    %38 = vector.broadcast %cst_13 : f32 to vector<4x128xf32>
    %39 = arith.addf %38, %37 : vector<4x128xf32>
    %cst_14 = arith.constant 1.000000e+00 : f32
    %40 = vector.broadcast %cst_14 : f32 to vector<4x128xf32>
    %41 = arith.divf %40, %39 : vector<4x128xf32>
    %42 = arith.mulf %1, %41 : vector<4x128xf32>
    %c0_15 = arith.constant 0 : index
    %43 = memref.load %arg10[%c0_15] : memref<7xf32, #tpu.memory_space<smem>>
    %c1 = arith.constant 1 : index
    %44 = memref.load %arg10[%c1] : memref<7xf32, #tpu.memory_space<smem>>
    %c2 = arith.constant 2 : index
    %45 = memref.load %arg10[%c2] : memref<7xf32, #tpu.memory_space<smem>>
    %46 = vector.broadcast %43 : f32 to vector<4x128xf32>
    %47 = arith.mulf %46, %1 : vector<4x128xf32>
    %48 = vector.broadcast %44 : f32 to vector<4x128xf32>
    %49 = arith.mulf %48, %42 : vector<4x128xf32>
    %50 = arith.subf %47, %49 : vector<4x128xf32>
    %51 = vector.broadcast %45 : f32 to vector<4x128xf32>
    %52 = arith.mulf %51, %50 : vector<4x128xf32>
    %cst_16 = arith.constant 1.000000e+00 : f32
    %53 = arith.subf %cst_16, %45 : f32
    %54 = vector.broadcast %53 : f32 to vector<4x128xf32>
    %55 = arith.mulf %54, %1 : vector<4x128xf32>
    %56 = arith.addf %52, %55 : vector<4x128xf32>
    %c1_17 = arith.constant 1 : index
    %c0_18 = arith.constant 0 : index
    %c0_19 = arith.constant 0 : index
    %57 = vector.load %arg4[%c1_17, %c0_18, %c0_19] : memref<2x4x4xf32, #tpu.memory_space<vmem>>, vector<1x4x4xf32>
    %58 = vector.shape_cast %57 : vector<1x4x4xf32> to vector<4x4xf32>
    %c1_20 = arith.constant 1 : index
    %c0_21 = arith.constant 0 : index
    %c0_22 = arith.constant 0 : index
    %59 = vector.load %arg5[%c1_20, %c0_21, %c0_22] : memref<2x4x1xf32, #tpu.memory_space<vmem>>, vector<1x4x1xf32>
    %60 = vector.shape_cast %59 : vector<1x4x1xf32> to vector<4x1xf32>
    %cst_23 = arith.constant 0.000000e+00 : f32
    %61 = vector.broadcast %cst_23 : f32 to vector<4x128xf32>
    %62 = vector.extract_strided_slice %58 {offsets = [0, 0], sizes = [4, 1], strides = [1, 1]} : vector<4x4xf32> to vector<4x1xf32>
    %63 = vector.extract_strided_slice %56 {offsets = [0, 0], sizes = [1, 128], strides = [1, 1]} : vector<4x128xf32> to vector<1x128xf32>
    %64 = vector.broadcast %62 : vector<4x1xf32> to vector<4x128xf32>
    %65 = vector.broadcast %63 : vector<1x128xf32> to vector<4x128xf32>
    %66 = arith.mulf %64, %65 : vector<4x128xf32>
    %67 = arith.addf %61, %66 : vector<4x128xf32>
    %68 = vector.extract_strided_slice %58 {offsets = [0, 1], sizes = [4, 1], strides = [1, 1]} : vector<4x4xf32> to vector<4x1xf32>
    %69 = vector.extract_strided_slice %56 {offsets = [1, 0], sizes = [1, 128], strides = [1, 1]} : vector<4x128xf32> to vector<1x128xf32>
    %70 = vector.broadcast %68 : vector<4x1xf32> to vector<4x128xf32>
    %71 = vector.broadcast %69 : vector<1x128xf32> to vector<4x128xf32>
    %72 = arith.mulf %70, %71 : vector<4x128xf32>
    %73 = arith.addf %67, %72 : vector<4x128xf32>
    %74 = vector.extract_strided_slice %58 {offsets = [0, 2], sizes = [4, 1], strides = [1, 1]} : vector<4x4xf32> to vector<4x1xf32>
    %75 = vector.extract_strided_slice %56 {offsets = [2, 0], sizes = [1, 128], strides = [1, 1]} : vector<4x128xf32> to vector<1x128xf32>
    %76 = vector.broadcast %74 : vector<4x1xf32> to vector<4x128xf32>
    %77 = vector.broadcast %75 : vector<1x128xf32> to vector<4x128xf32>
    %78 = arith.mulf %76, %77 : vector<4x128xf32>
    %79 = arith.addf %73, %78 : vector<4x128xf32>
    %80 = vector.extract_strided_slice %58 {offsets = [0, 3], sizes = [4, 1], strides = [1, 1]} : vector<4x4xf32> to vector<4x1xf32>
    %81 = vector.extract_strided_slice %56 {offsets = [3, 0], sizes = [1, 128], strides = [1, 1]} : vector<4x128xf32> to vector<1x128xf32>
    %82 = vector.broadcast %80 : vector<4x1xf32> to vector<4x128xf32>
    %83 = vector.broadcast %81 : vector<1x128xf32> to vector<4x128xf32>
    %84 = arith.mulf %82, %83 : vector<4x128xf32>
    %85 = arith.addf %79, %84 : vector<4x128xf32>
    %86 = vector.broadcast %60 : vector<4x1xf32> to vector<4x128xf32>
    %87 = arith.addf %85, %86 : vector<4x128xf32>
    %cst_24 = arith.constant 0.000000e+00 : f32
    %88 = vector.broadcast %cst_24 : f32 to vector<4x128xf32>
    %89 = arith.subf %88, %87 : vector<4x128xf32>
    %90 = math.exp %89 : vector<4x128xf32>
    %cst_25 = arith.constant 1.000000e+00 : f32
    %91 = vector.broadcast %cst_25 : f32 to vector<4x128xf32>
    %92 = arith.addf %91, %90 : vector<4x128xf32>
    %cst_26 = arith.constant 1.000000e+00 : f32
    %93 = vector.broadcast %cst_26 : f32 to vector<4x128xf32>
    %94 = arith.divf %93, %92 : vector<4x128xf32>
    %95 = arith.mulf %56, %94 : vector<4x128xf32>
    %c3 = arith.constant 3 : index
    %96 = memref.load %arg10[%c3] : memref<7xf32, #tpu.memory_space<smem>>
    %c4 = arith.constant 4 : index
    %97 = memref.load %arg10[%c4] : memref<7xf32, #tpu.memory_space<smem>>
    %c5 = arith.constant 5 : index
    %98 = memref.load %arg10[%c5] : memref<7xf32, #tpu.memory_space<smem>>
    %99 = vector.broadcast %96 : f32 to vector<4x128xf32>
    %100 = arith.mulf %99, %56 : vector<4x128xf32>
    %101 = vector.broadcast %97 : f32 to vector<4x128xf32>
    %102 = arith.mulf %101, %95 : vector<4x128xf32>
    %103 = arith.subf %100, %102 : vector<4x128xf32>
    %104 = vector.broadcast %98 : f32 to vector<4x128xf32>
    %105 = arith.mulf %104, %103 : vector<4x128xf32>
    %cst_27 = arith.constant 1.000000e+00 : f32
    %106 = arith.subf %cst_27, %98 : f32
    %107 = vector.broadcast %106 : f32 to vector<4x128xf32>
    %108 = arith.mulf %107, %56 : vector<4x128xf32>
    %109 = arith.addf %105, %108 : vector<4x128xf32>
    %c0_28 = arith.constant 0 : index
    %c0_29 = arith.constant 0 : index
    %c0_30 = arith.constant 0 : index
    %110 = vector.load %arg4[%c0_28, %c0_29, %c0_30] : memref<2x4x4xf32, #tpu.memory_space<vmem>>, vector<1x4x4xf32>
    %111 = vector.shape_cast %110 : vector<1x4x4xf32> to vector<4x4xf32>
    %c0_31 = arith.constant 0 : index
    %c0_32 = arith.constant 0 : index
    %c0_33 = arith.constant 0 : index
    %112 = vector.load %arg5[%c0_31, %c0_32, %c0_33] : memref<2x4x1xf32, #tpu.memory_space<vmem>>, vector<1x4x1xf32>
    %113 = vector.shape_cast %112 : vector<1x4x1xf32> to vector<4x1xf32>
    %cst_34 = arith.constant 0.000000e+00 : f32
    %114 = vector.broadcast %cst_34 : f32 to vector<4x32xf32>
    %115 = vector.extract_strided_slice %111 {offsets = [0, 0], sizes = [4, 1], strides = [1, 1]} : vector<4x4xf32> to vector<4x1xf32>
    %116 = vector.extract_strided_slice %3 {offsets = [0, 0], sizes = [1, 32], strides = [1, 1]} : vector<4x32xf32> to vector<1x32xf32>
    %117 = vector.broadcast %115 : vector<4x1xf32> to vector<4x32xf32>
    %118 = vector.broadcast %116 : vector<1x32xf32> to vector<4x32xf32>
    %119 = arith.mulf %117, %118 : vector<4x32xf32>
    %120 = arith.addf %114, %119 : vector<4x32xf32>
    %121 = vector.extract_strided_slice %111 {offsets = [0, 1], sizes = [4, 1], strides = [1, 1]} : vector<4x4xf32> to vector<4x1xf32>
    %122 = vector.extract_strided_slice %3 {offsets = [1, 0], sizes = [1, 32], strides = [1, 1]} : vector<4x32xf32> to vector<1x32xf32>
    %123 = vector.broadcast %121 : vector<4x1xf32> to vector<4x32xf32>
    %124 = vector.broadcast %122 : vector<1x32xf32> to vector<4x32xf32>
    %125 = arith.mulf %123, %124 : vector<4x32xf32>
    %126 = arith.addf %120, %125 : vector<4x32xf32>
    %127 = vector.extract_strided_slice %111 {offsets = [0, 2], sizes = [4, 1], strides = [1, 1]} : vector<4x4xf32> to vector<4x1xf32>
    %128 = vector.extract_strided_slice %3 {offsets = [2, 0], sizes = [1, 32], strides = [1, 1]} : vector<4x32xf32> to vector<1x32xf32>
    %129 = vector.broadcast %127 : vector<4x1xf32> to vector<4x32xf32>
    %130 = vector.broadcast %128 : vector<1x32xf32> to vector<4x32xf32>
    %131 = arith.mulf %129, %130 : vector<4x32xf32>
    %132 = arith.addf %126, %131 : vector<4x32xf32>
    %133 = vector.extract_strided_slice %111 {offsets = [0, 3], sizes = [4, 1], strides = [1, 1]} : vector<4x4xf32> to vector<4x1xf32>
    %134 = vector.extract_strided_slice %3 {offsets = [3, 0], sizes = [1, 32], strides = [1, 1]} : vector<4x32xf32> to vector<1x32xf32>
    %135 = vector.broadcast %133 : vector<4x1xf32> to vector<4x32xf32>
    %136 = vector.broadcast %134 : vector<1x32xf32> to vector<4x32xf32>
    %137 = arith.mulf %135, %136 : vector<4x32xf32>
    %138 = arith.addf %132, %137 : vector<4x32xf32>
    %139 = vector.broadcast %113 : vector<4x1xf32> to vector<4x32xf32>
    %140 = arith.addf %138, %139 : vector<4x32xf32>
    %cst_35 = arith.constant 0.000000e+00 : f32
    %141 = vector.broadcast %cst_35 : f32 to vector<4x32xf32>
    %142 = arith.subf %141, %140 : vector<4x32xf32>
    %143 = math.exp %142 : vector<4x32xf32>
    %cst_36 = arith.constant 1.000000e+00 : f32
    %144 = vector.broadcast %cst_36 : f32 to vector<4x32xf32>
    %145 = arith.addf %144, %143 : vector<4x32xf32>
    %cst_37 = arith.constant 1.000000e+00 : f32
    %146 = vector.broadcast %cst_37 : f32 to vector<4x32xf32>
    %147 = arith.divf %146, %145 : vector<4x32xf32>
    %148 = arith.mulf %3, %147 : vector<4x32xf32>
    %c0_38 = arith.constant 0 : index
    %149 = memref.load %arg10[%c0_38] : memref<7xf32, #tpu.memory_space<smem>>
    %c1_39 = arith.constant 1 : index
    %150 = memref.load %arg10[%c1_39] : memref<7xf32, #tpu.memory_space<smem>>
    %c2_40 = arith.constant 2 : index
    %151 = memref.load %arg10[%c2_40] : memref<7xf32, #tpu.memory_space<smem>>
    %152 = vector.broadcast %149 : f32 to vector<4x32xf32>
    %153 = arith.mulf %152, %3 : vector<4x32xf32>
    %154 = vector.broadcast %150 : f32 to vector<4x32xf32>
    %155 = arith.mulf %154, %148 : vector<4x32xf32>
    %156 = arith.subf %153, %155 : vector<4x32xf32>
    %157 = vector.broadcast %151 : f32 to vector<4x32xf32>
    %158 = arith.mulf %157, %156 : vector<4x32xf32>
    %cst_41 = arith.constant 1.000000e+00 : f32
    %159 = arith.subf %cst_41, %151 : f32
    %160 = vector.broadcast %159 : f32 to vector<4x32xf32>
    %161 = arith.mulf %160, %3 : vector<4x32xf32>
    %162 = arith.addf %158, %161 : vector<4x32xf32>
    %c1_42 = arith.constant 1 : index
    %c0_43 = arith.constant 0 : index
    %c0_44 = arith.constant 0 : index
    %163 = vector.load %arg4[%c1_42, %c0_43, %c0_44] : memref<2x4x4xf32, #tpu.memory_space<vmem>>, vector<1x4x4xf32>
    %164 = vector.shape_cast %163 : vector<1x4x4xf32> to vector<4x4xf32>
    %c1_45 = arith.constant 1 : index
    %c0_46 = arith.constant 0 : index
    %c0_47 = arith.constant 0 : index
    %165 = vector.load %arg5[%c1_45, %c0_46, %c0_47] : memref<2x4x1xf32, #tpu.memory_space<vmem>>, vector<1x4x1xf32>
    %166 = vector.shape_cast %165 : vector<1x4x1xf32> to vector<4x1xf32>
    %cst_48 = arith.constant 0.000000e+00 : f32
    %167 = vector.broadcast %cst_48 : f32 to vector<4x32xf32>
    %168 = vector.extract_strided_slice %164 {offsets = [0, 0], sizes = [4, 1], strides = [1, 1]} : vector<4x4xf32> to vector<4x1xf32>
    %169 = vector.extract_strided_slice %162 {offsets = [0, 0], sizes = [1, 32], strides = [1, 1]} : vector<4x32xf32> to vector<1x32xf32>
    %170 = vector.broadcast %168 : vector<4x1xf32> to vector<4x32xf32>
    %171 = vector.broadcast %169 : vector<1x32xf32> to vector<4x32xf32>
    %172 = arith.mulf %170, %171 : vector<4x32xf32>
    %173 = arith.addf %167, %172 : vector<4x32xf32>
    %174 = vector.extract_strided_slice %164 {offsets = [0, 1], sizes = [4, 1], strides = [1, 1]} : vector<4x4xf32> to vector<4x1xf32>
    %175 = vector.extract_strided_slice %162 {offsets = [1, 0], sizes = [1, 32], strides = [1, 1]} : vector<4x32xf32> to vector<1x32xf32>
    %176 = vector.broadcast %174 : vector<4x1xf32> to vector<4x32xf32>
    %177 = vector.broadcast %175 : vector<1x32xf32> to vector<4x32xf32>
    %178 = arith.mulf %176, %177 : vector<4x32xf32>
    %179 = arith.addf %173, %178 : vector<4x32xf32>
    %180 = vector.extract_strided_slice %164 {offsets = [0, 2], sizes = [4, 1], strides = [1, 1]} : vector<4x4xf32> to vector<4x1xf32>
    %181 = vector.extract_strided_slice %162 {offsets = [2, 0], sizes = [1, 32], strides = [1, 1]} : vector<4x32xf32> to vector<1x32xf32>
    %182 = vector.broadcast %180 : vector<4x1xf32> to vector<4x32xf32>
    %183 = vector.broadcast %181 : vector<1x32xf32> to vector<4x32xf32>
    %184 = arith.mulf %182, %183 : vector<4x32xf32>
    %185 = arith.addf %179, %184 : vector<4x32xf32>
    %186 = vector.extract_strided_slice %164 {offsets = [0, 3], sizes = [4, 1], strides = [1, 1]} : vector<4x4xf32> to vector<4x1xf32>
    %187 = vector.extract_strided_slice %162 {offsets = [3, 0], sizes = [1, 32], strides = [1, 1]} : vector<4x32xf32> to vector<1x32xf32>
    %188 = vector.broadcast %186 : vector<4x1xf32> to vector<4x32xf32>
    %189 = vector.broadcast %187 : vector<1x32xf32> to vector<4x32xf32>
    %190 = arith.mulf %188, %189 : vector<4x32xf32>
    %191 = arith.addf %185, %190 : vector<4x32xf32>
    %192 = vector.broadcast %166 : vector<4x1xf32> to vector<4x32xf32>
    %193 = arith.addf %191, %192 : vector<4x32xf32>
    %cst_49 = arith.constant 0.000000e+00 : f32
    %194 = vector.broadcast %cst_49 : f32 to vector<4x32xf32>
    %195 = arith.subf %194, %193 : vector<4x32xf32>
    %196 = math.exp %195 : vector<4x32xf32>
    %cst_50 = arith.constant 1.000000e+00 : f32
    %197 = vector.broadcast %cst_50 : f32 to vector<4x32xf32>
    %198 = arith.addf %197, %196 : vector<4x32xf32>
    %cst_51 = arith.constant 1.000000e+00 : f32
    %199 = vector.broadcast %cst_51 : f32 to vector<4x32xf32>
    %200 = arith.divf %199, %198 : vector<4x32xf32>
    %201 = arith.mulf %162, %200 : vector<4x32xf32>
    %c3_52 = arith.constant 3 : index
    %202 = memref.load %arg10[%c3_52] : memref<7xf32, #tpu.memory_space<smem>>
    %c4_53 = arith.constant 4 : index
    %203 = memref.load %arg10[%c4_53] : memref<7xf32, #tpu.memory_space<smem>>
    %c5_54 = arith.constant 5 : index
    %204 = memref.load %arg10[%c5_54] : memref<7xf32, #tpu.memory_space<smem>>
    %205 = vector.broadcast %202 : f32 to vector<4x32xf32>
    %206 = arith.mulf %205, %162 : vector<4x32xf32>
    %207 = vector.broadcast %203 : f32 to vector<4x32xf32>
    %208 = arith.mulf %207, %201 : vector<4x32xf32>
    %209 = arith.subf %206, %208 : vector<4x32xf32>
    %210 = vector.broadcast %204 : f32 to vector<4x32xf32>
    %211 = arith.mulf %210, %209 : vector<4x32xf32>
    %cst_55 = arith.constant 1.000000e+00 : f32
    %212 = arith.subf %cst_55, %204 : f32
    %213 = vector.broadcast %212 : f32 to vector<4x32xf32>
    %214 = arith.mulf %213, %162 : vector<4x32xf32>
    %215 = arith.addf %211, %214 : vector<4x32xf32>
    %cst_56 = arith.constant 0.000000e+00 : f32
    %216 = vector.broadcast %cst_56 : f32 to vector<4x16xf32>
    %c0_57 = arith.constant 0 : index
    %c0_58 = arith.constant 0 : index
    %217 = vector.load %arg12[%c0_57, %c0_58] : memref<4x192xf32, #tpu.memory_space<vmem>>, vector<4x16xf32>
    tpu.vector_store %arg12[%c0_57, %c0_58], %216 {strides = array<i32>} : memref<4x192xf32, #tpu.memory_space<vmem>>, vector<4x16xf32>,
    %218 = vector.extract_strided_slice %215 {offsets = [0, 0], sizes = [4, 16], strides = [1, 1]} : vector<4x32xf32> to vector<4x16xf32>
    %c0_59 = arith.constant 0 : index
    %c16 = arith.constant 16 : index
    %219 = vector.load %arg12[%c0_59, %c16] : memref<4x192xf32, #tpu.memory_space<vmem>>, vector<4x16xf32>
    tpu.vector_store %arg12[%c0_59, %c16], %218 {strides = array<i32>} : memref<4x192xf32, #tpu.memory_space<vmem>>, vector<4x16xf32>,
    %c0_60 = arith.constant 0 : index
    %c32 = arith.constant 32 : index
    %220 = vector.load %arg12[%c0_60, %c32] : memref<4x192xf32, #tpu.memory_space<vmem>>, vector<4x128xf32>
    tpu.vector_store %arg12[%c0_60, %c32], %109 {strides = array<i32>} : memref<4x192xf32, #tpu.memory_space<vmem>>, vector<4x128xf32>,
    %221 = vector.extract_strided_slice %215 {offsets = [0, 16], sizes = [4, 16], strides = [1, 1]} : vector<4x32xf32> to vector<4x16xf32>
    %c0_61 = arith.constant 0 : index
    %c160 = arith.constant 160 : index
    %222 = vector.load %arg12[%c0_61, %c160] : memref<4x192xf32, #tpu.memory_space<vmem>>, vector<4x16xf32>
    tpu.vector_store %arg12[%c0_61, %c160], %221 {strides = array<i32>} : memref<4x192xf32, #tpu.memory_space<vmem>>, vector<4x16xf32>,
    %c0_62 = arith.constant 0 : index
    %c176 = arith.constant 176 : index
    %223 = vector.load %arg12[%c0_62, %c176] : memref<4x192xf32, #tpu.memory_space<vmem>>, vector<4x16xf32>
    tpu.vector_store %arg12[%c0_62, %c176], %216 {strides = array<i32>} : memref<4x192xf32, #tpu.memory_space<vmem>>, vector<4x16xf32>,
    %224 = tpu.iota {dimensions = array<i32: 1>} : vector<1x128xi32>
    %c16_i32 = arith.constant 16 : i32
    %c0_i32 = arith.constant 0 : i32
    %225 = arith.cmpi eq, %c16_i32, %c0_i32 : i32
    %c1_i32 = arith.constant 1 : i32
    %226 = arith.select %225, %c1_i32, %c16_i32 : i32
    %227 = vector.broadcast %226 : i32 to vector<1x128xi32>
    %228 = arith.remsi %224, %227 : vector<1x128xi32>
    %c0_i32_63 = arith.constant 0 : i32
    %229 = vector.broadcast %c0_i32_63 : i32 to vector<1x128xi32>
    %230 = arith.cmpi ne, %228, %229 : vector<1x128xi32>
    %c0_i32_64 = arith.constant 0 : i32
    %231 = vector.broadcast %c0_i32_64 : i32 to vector<1x128xi32>
    %232 = arith.cmpi slt, %228, %231 : vector<1x128xi32>
    %c0_i32_65 = arith.constant 0 : i32
    %233 = arith.cmpi slt, %226, %c0_i32_65 : i32
    %234 = vector.broadcast %233 : i1 to vector<1x128xi1>
    %235 = vector.broadcast %234 : vector<1x128xi1> to vector<1x128xi1>
    %236 = arith.xori %232, %235 : vector<1x128xi1>
    %237 = arith.andi %236, %230 : vector<1x128xi1>
    %238 = vector.broadcast %226 : i32 to vector<1x128xi32>
    %239 = arith.addi %228, %238 : vector<1x128xi32>
    %240 = arith.select %237, %239, %228 : vector<1x128xi1>, vector<1x128xi32>
    %cst_66 = arith.constant 0.000000e+00 : f32
    %241 = vector.broadcast %cst_66 : f32 to vector<4x128xf32>
    %c0_67 = arith.constant 0 : index
    %c15 = arith.constant 15 : index
    %242 = vector.load %arg12[%c0_67, %c15] : memref<4x192xf32, #tpu.memory_space<vmem>>, vector<4x128xf32>
    %c0_i32_68 = arith.constant 0 : i32
    %243 = vector.broadcast %c0_i32_68 : i32 to vector<1x128xi32>
    %244 = arith.cmpi ne, %240, %243 : vector<1x128xi32>
    %cst_69 = arith.constant 0.000000e+00 : f32
    %245 = vector.shape_cast %244 : vector<1x128xi1> to vector<1x128xi1>
    %246 = vector.broadcast %245 : vector<1x128xi1> to vector<4x128xi1>
    %247 = vector.broadcast %cst_69 : f32 to vector<4x128xf32>
    %248 = arith.select %246, %242, %247 : vector<4x128xi1>, vector<4x128xf32>
    %c0_70 = arith.constant 0 : index
    %c0_71 = arith.constant 0 : index
    %c0_72 = arith.constant 0 : index
    %249 = vector.load %arg6[%c0_70, %c0_71, %c0_72] : memref<9x4x4xf32, #tpu.memory_space<vmem>>, vector<1x4x4xf32>
    %250 = vector.shape_cast %249 : vector<1x4x4xf32> to vector<4x4xf32>
    %cst_73 = arith.constant 0.000000e+00 : f32
    %251 = vector.broadcast %cst_73 : f32 to vector<4x128xf32>
    %252 = vector.extract_strided_slice %250 {offsets = [0, 0], sizes = [4, 1], strides = [1, 1]} : vector<4x4xf32> to vector<4x1xf32>
    %253 = vector.extract_strided_slice %248 {offsets = [0, 0], sizes = [1, 128], strides = [1, 1]} : vector<4x128xf32> to vector<1x128xf32>
    %254 = vector.broadcast %252 : vector<4x1xf32> to vector<4x128xf32>
    %255 = vector.broadcast %253 : vector<1x128xf32> to vector<4x128xf32>
    %256 = arith.mulf %254, %255 : vector<4x128xf32>
    %257 = arith.addf %251, %256 : vector<4x128xf32>
    %258 = vector.extract_strided_slice %250 {offsets = [0, 1], sizes = [4, 1], strides = [1, 1]} : vector<4x4xf32> to vector<4x1xf32>
    %259 = vector.extract_strided_slice %248 {offsets = [1, 0], sizes = [1, 128], strides = [1, 1]} : vector<4x128xf32> to vector<1x128xf32>
    %260 = vector.broadcast %258 : vector<4x1xf32> to vector<4x128xf32>
    %261 = vector.broadcast %259 : vector<1x128xf32> to vector<4x128xf32>
    %262 = arith.mulf %260, %261 : vector<4x128xf32>
    %263 = arith.addf %257, %262 : vector<4x128xf32>
    %264 = vector.extract_strided_slice %250 {offsets = [0, 2], sizes = [4, 1], strides = [1, 1]} : vector<4x4xf32> to vector<4x1xf32>
    %265 = vector.extract_strided_slice %248 {offsets = [2, 0], sizes = [1, 128], strides = [1, 1]} : vector<4x128xf32> to vector<1x128xf32>
    %266 = vector.broadcast %264 : vector<4x1xf32> to vector<4x128xf32>
    %267 = vector.broadcast %265 : vector<1x128xf32> to vector<4x128xf32>
    %268 = arith.mulf %266, %267 : vector<4x128xf32>
    %269 = arith.addf %263, %268 : vector<4x128xf32>
    %270 = vector.extract_strided_slice %250 {offsets = [0, 3], sizes = [4, 1], strides = [1, 1]} : vector<4x4xf32> to vector<4x1xf32>
    %271 = vector.extract_strided_slice %248 {offsets = [3, 0], sizes = [1, 128], strides = [1, 1]} : vector<4x128xf32> to vector<1x128xf32>
    %272 = vector.broadcast %270 : vector<4x1xf32> to vector<4x128xf32>
    %273 = vector.broadcast %271 : vector<1x128xf32> to vector<4x128xf32>
    %274 = arith.mulf %272, %273 : vector<4x128xf32>
    %275 = arith.addf %269, %274 : vector<4x128xf32>
    %276 = arith.addf %241, %275 : vector<4x128xf32>
    %c0_74 = arith.constant 0 : index
    %c16_75 = arith.constant 16 : index
    %277 = vector.load %arg12[%c0_74, %c16_75] : memref<4x192xf32, #tpu.memory_space<vmem>>, vector<4x128xf32>
    %c1_76 = arith.constant 1 : index
    %c0_77 = arith.constant 0 : index
    %c0_78 = arith.constant 0 : index
    %278 = vector.load %arg6[%c1_76, %c0_77, %c0_78] : memref<9x4x4xf32, #tpu.memory_space<vmem>>, vector<1x4x4xf32>
    %279 = vector.shape_cast %278 : vector<1x4x4xf32> to vector<4x4xf32>
    %cst_79 = arith.constant 0.000000e+00 : f32
    %280 = vector.broadcast %cst_79 : f32 to vector<4x128xf32>
    %281 = vector.extract_strided_slice %279 {offsets = [0, 0], sizes = [4, 1], strides = [1, 1]} : vector<4x4xf32> to vector<4x1xf32>
    %282 = vector.extract_strided_slice %277 {offsets = [0, 0], sizes = [1, 128], strides = [1, 1]} : vector<4x128xf32> to vector<1x128xf32>
    %283 = vector.broadcast %281 : vector<4x1xf32> to vector<4x128xf32>
    %284 = vector.broadcast %282 : vector<1x128xf32> to vector<4x128xf32>
    %285 = arith.mulf %283, %284 : vector<4x128xf32>
    %286 = arith.addf %280, %285 : vector<4x128xf32>
    %287 = vector.extract_strided_slice %279 {offsets = [0, 1], sizes = [4, 1], strides = [1, 1]} : vector<4x4xf32> to vector<4x1xf32>
    %288 = vector.extract_strided_slice %277 {offsets = [1, 0], sizes = [1, 128], strides = [1, 1]} : vector<4x128xf32> to vector<1x128xf32>
    %289 = vector.broadcast %287 : vector<4x1xf32> to vector<4x128xf32>
    %290 = vector.broadcast %288 : vector<1x128xf32> to vector<4x128xf32>
    %291 = arith.mulf %289, %290 : vector<4x128xf32>
    %292 = arith.addf %286, %291 : vector<4x128xf32>
    %293 = vector.extract_strided_slice %279 {offsets = [0, 2], sizes = [4, 1], strides = [1, 1]} : vector<4x4xf32> to vector<4x1xf32>
    %294 = vector.extract_strided_slice %277 {offsets = [2, 0], sizes = [1, 128], strides = [1, 1]} : vector<4x128xf32> to vector<1x128xf32>
    %295 = vector.broadcast %293 : vector<4x1xf32> to vector<4x128xf32>
    %296 = vector.broadcast %294 : vector<1x128xf32> to vector<4x128xf32>
    %297 = arith.mulf %295, %296 : vector<4x128xf32>
    %298 = arith.addf %292, %297 : vector<4x128xf32>
    %299 = vector.extract_strided_slice %279 {offsets = [0, 3], sizes = [4, 1], strides = [1, 1]} : vector<4x4xf32> to vector<4x1xf32>
    %300 = vector.extract_strided_slice %277 {offsets = [3, 0], sizes = [1, 128], strides = [1, 1]} : vector<4x128xf32> to vector<1x128xf32>
    %301 = vector.broadcast %299 : vector<4x1xf32> to vector<4x128xf32>
    %302 = vector.broadcast %300 : vector<1x128xf32> to vector<4x128xf32>
    %303 = arith.mulf %301, %302 : vector<4x128xf32>
    %304 = arith.addf %298, %303 : vector<4x128xf32>
    %305 = arith.addf %276, %304 : vector<4x128xf32>
    %c0_80 = arith.constant 0 : index
    %c17 = arith.constant 17 : index
    %306 = vector.load %arg12[%c0_80, %c17] : memref<4x192xf32, #tpu.memory_space<vmem>>, vector<4x128xf32>
    %c15_i32 = arith.constant 15 : i32
    %307 = vector.broadcast %c15_i32 : i32 to vector<1x128xi32>
    %308 = arith.cmpi ne, %240, %307 : vector<1x128xi32>
    %cst_81 = arith.constant 0.000000e+00 : f32
    %309 = vector.shape_cast %308 : vector<1x128xi1> to vector<1x128xi1>
    %310 = vector.broadcast %309 : vector<1x128xi1> to vector<4x128xi1>
    %311 = vector.broadcast %cst_81 : f32 to vector<4x128xf32>
    %312 = arith.select %310, %306, %311 : vector<4x128xi1>, vector<4x128xf32>
    %c2_82 = arith.constant 2 : index
    %c0_83 = arith.constant 0 : index
    %c0_84 = arith.constant 0 : index
    %313 = vector.load %arg6[%c2_82, %c0_83, %c0_84] : memref<9x4x4xf32, #tpu.memory_space<vmem>>, vector<1x4x4xf32>
    %314 = vector.shape_cast %313 : vector<1x4x4xf32> to vector<4x4xf32>
    %cst_85 = arith.constant 0.000000e+00 : f32
    %315 = vector.broadcast %cst_85 : f32 to vector<4x128xf32>
    %316 = vector.extract_strided_slice %314 {offsets = [0, 0], sizes = [4, 1], strides = [1, 1]} : vector<4x4xf32> to vector<4x1xf32>
    %317 = vector.extract_strided_slice %312 {offsets = [0, 0], sizes = [1, 128], strides = [1, 1]} : vector<4x128xf32> to vector<1x128xf32>
    %318 = vector.broadcast %316 : vector<4x1xf32> to vector<4x128xf32>
    %319 = vector.broadcast %317 : vector<1x128xf32> to vector<4x128xf32>
    %320 = arith.mulf %318, %319 : vector<4x128xf32>
    %321 = arith.addf %315, %320 : vector<4x128xf32>
    %322 = vector.extract_strided_slice %314 {offsets = [0, 1], sizes = [4, 1], strides = [1, 1]} : vector<4x4xf32> to vector<4x1xf32>
    %323 = vector.extract_strided_slice %312 {offsets = [1, 0], sizes = [1, 128], strides = [1, 1]} : vector<4x128xf32> to vector<1x128xf32>
    %324 = vector.broadcast %322 : vector<4x1xf32> to vector<4x128xf32>
    %325 = vector.broadcast %323 : vector<1x128xf32> to vector<4x128xf32>
    %326 = arith.mulf %324, %325 : vector<4x128xf32>
    %327 = arith.addf %321, %326 : vector<4x128xf32>
    %328 = vector.extract_strided_slice %314 {offsets = [0, 2], sizes = [4, 1], strides = [1, 1]} : vector<4x4xf32> to vector<4x1xf32>
    %329 = vector.extract_strided_slice %312 {offsets = [2, 0], sizes = [1, 128], strides = [1, 1]} : vector<4x128xf32> to vector<1x128xf32>
    %330 = vector.broadcast %328 : vector<4x1xf32> to vector<4x128xf32>
    %331 = vector.broadcast %329 : vector<1x128xf32> to vector<4x128xf32>
    %332 = arith.mulf %330, %331 : vector<4x128xf32>
    %333 = arith.addf %327, %332 : vector<4x128xf32>
    %334 = vector.extract_strided_slice %314 {offsets = [0, 3], sizes = [4, 1], strides = [1, 1]} : vector<4x4xf32> to vector<4x1xf32>
    %335 = vector.extract_strided_slice %312 {offsets = [3, 0], sizes = [1, 128], strides = [1, 1]} : vector<4x128xf32> to vector<1x128xf32>
    %336 = vector.broadcast %334 : vector<4x1xf32> to vector<4x128xf32>
    %337 = vector.broadcast %335 : vector<1x128xf32> to vector<4x128xf32>
    %338 = arith.mulf %336, %337 : vector<4x128xf32>
    %339 = arith.addf %333, %338 : vector<4x128xf32>
    %340 = arith.addf %305, %339 : vector<4x128xf32>
    %c0_86 = arith.constant 0 : index
    %c31 = arith.constant 31 : index
    %341 = vector.load %arg12[%c0_86, %c31] : memref<4x192xf32, #tpu.memory_space<vmem>>, vector<4x128xf32>
    %c0_i32_87 = arith.constant 0 : i32
    %342 = vector.broadcast %c0_i32_87 : i32 to vector<1x128xi32>
    %343 = arith.cmpi ne, %240, %342 : vector<1x128xi32>
    %cst_88 = arith.constant 0.000000e+00 : f32
    %344 = vector.shape_cast %343 : vector<1x128xi1> to vector<1x128xi1>
    %345 = vector.broadcast %344 : vector<1x128xi1> to vector<4x128xi1>
    %346 = vector.broadcast %cst_88 : f32 to vector<4x128xf32>
    %347 = arith.select %345, %341, %346 : vector<4x128xi1>, vector<4x128xf32>
    %c3_89 = arith.constant 3 : index
    %c0_90 = arith.constant 0 : index
    %c0_91 = arith.constant 0 : index
    %348 = vector.load %arg6[%c3_89, %c0_90, %c0_91] : memref<9x4x4xf32, #tpu.memory_space<vmem>>, vector<1x4x4xf32>
    %349 = vector.shape_cast %348 : vector<1x4x4xf32> to vector<4x4xf32>
    %cst_92 = arith.constant 0.000000e+00 : f32
    %350 = vector.broadcast %cst_92 : f32 to vector<4x128xf32>
    %351 = vector.extract_strided_slice %349 {offsets = [0, 0], sizes = [4, 1], strides = [1, 1]} : vector<4x4xf32> to vector<4x1xf32>
    %352 = vector.extract_strided_slice %347 {offsets = [0, 0], sizes = [1, 128], strides = [1, 1]} : vector<4x128xf32> to vector<1x128xf32>
    %353 = vector.broadcast %351 : vector<4x1xf32> to vector<4x128xf32>
    %354 = vector.broadcast %352 : vector<1x128xf32> to vector<4x128xf32>
    %355 = arith.mulf %353, %354 : vector<4x128xf32>
    %356 = arith.addf %350, %355 : vector<4x128xf32>
    %357 = vector.extract_strided_slice %349 {offsets = [0, 1], sizes = [4, 1], strides = [1, 1]} : vector<4x4xf32> to vector<4x1xf32>
    %358 = vector.extract_strided_slice %347 {offsets = [1, 0], sizes = [1, 128], strides = [1, 1]} : vector<4x128xf32> to vector<1x128xf32>
    %359 = vector.broadcast %357 : vector<4x1xf32> to vector<4x128xf32>
    %360 = vector.broadcast %358 : vector<1x128xf32> to vector<4x128xf32>
    %361 = arith.mulf %359, %360 : vector<4x128xf32>
    %362 = arith.addf %356, %361 : vector<4x128xf32>
    %363 = vector.extract_strided_slice %349 {offsets = [0, 2], sizes = [4, 1], strides = [1, 1]} : vector<4x4xf32> to vector<4x1xf32>
    %364 = vector.extract_strided_slice %347 {offsets = [2, 0], sizes = [1, 128], strides = [1, 1]} : vector<4x128xf32> to vector<1x128xf32>
    %365 = vector.broadcast %363 : vector<4x1xf32> to vector<4x128xf32>
    %366 = vector.broadcast %364 : vector<1x128xf32> to vector<4x128xf32>
    %367 = arith.mulf %365, %366 : vector<4x128xf32>
    %368 = arith.addf %362, %367 : vector<4x128xf32>
    %369 = vector.extract_strided_slice %349 {offsets = [0, 3], sizes = [4, 1], strides = [1, 1]} : vector<4x4xf32> to vector<4x1xf32>
    %370 = vector.extract_strided_slice %347 {offsets = [3, 0], sizes = [1, 128], strides = [1, 1]} : vector<4x128xf32> to vector<1x128xf32>
    %371 = vector.broadcast %369 : vector<4x1xf32> to vector<4x128xf32>
    %372 = vector.broadcast %370 : vector<1x128xf32> to vector<4x128xf32>
    %373 = arith.mulf %371, %372 : vector<4x128xf32>
    %374 = arith.addf %368, %373 : vector<4x128xf32>
    %375 = arith.addf %340, %374 : vector<4x128xf32>
    %c0_93 = arith.constant 0 : index
    %c32_94 = arith.constant 32 : index
    %376 = vector.load %arg12[%c0_93, %c32_94] : memref<4x192xf32, #tpu.memory_space<vmem>>, vector<4x128xf32>
    %c4_95 = arith.constant 4 : index
    %c0_96 = arith.constant 0 : index
    %c0_97 = arith.constant 0 : index
    %377 = vector.load %arg6[%c4_95, %c0_96, %c0_97] : memref<9x4x4xf32, #tpu.memory_space<vmem>>, vector<1x4x4xf32>
    %378 = vector.shape_cast %377 : vector<1x4x4xf32> to vector<4x4xf32>
    %cst_98 = arith.constant 0.000000e+00 : f32
    %379 = vector.broadcast %cst_98 : f32 to vector<4x128xf32>
    %380 = vector.extract_strided_slice %378 {offsets = [0, 0], sizes = [4, 1], strides = [1, 1]} : vector<4x4xf32> to vector<4x1xf32>
    %381 = vector.extract_strided_slice %376 {offsets = [0, 0], sizes = [1, 128], strides = [1, 1]} : vector<4x128xf32> to vector<1x128xf32>
    %382 = vector.broadcast %380 : vector<4x1xf32> to vector<4x128xf32>
    %383 = vector.broadcast %381 : vector<1x128xf32> to vector<4x128xf32>
    %384 = arith.mulf %382, %383 : vector<4x128xf32>
    %385 = arith.addf %379, %384 : vector<4x128xf32>
    %386 = vector.extract_strided_slice %378 {offsets = [0, 1], sizes = [4, 1], strides = [1, 1]} : vector<4x4xf32> to vector<4x1xf32>
    %387 = vector.extract_strided_slice %376 {offsets = [1, 0], sizes = [1, 128], strides = [1, 1]} : vector<4x128xf32> to vector<1x128xf32>
    %388 = vector.broadcast %386 : vector<4x1xf32> to vector<4x128xf32>
    %389 = vector.broadcast %387 : vector<1x128xf32> to vector<4x128xf32>
    %390 = arith.mulf %388, %389 : vector<4x128xf32>
    %391 = arith.addf %385, %390 : vector<4x128xf32>
    %392 = vector.extract_strided_slice %378 {offsets = [0, 2], sizes = [4, 1], strides = [1, 1]} : vector<4x4xf32> to vector<4x1xf32>
    %393 = vector.extract_strided_slice %376 {offsets = [2, 0], sizes = [1, 128], strides = [1, 1]} : vector<4x128xf32> to vector<1x128xf32>
    %394 = vector.broadcast %392 : vector<4x1xf32> to vector<4x128xf32>
    %395 = vector.broadcast %393 : vector<1x128xf32> to vector<4x128xf32>
    %396 = arith.mulf %394, %395 : vector<4x128xf32>
    %397 = arith.addf %391, %396 : vector<4x128xf32>
    %398 = vector.extract_strided_slice %378 {offsets = [0, 3], sizes = [4, 1], strides = [1, 1]} : vector<4x4xf32> to vector<4x1xf32>
    %399 = vector.extract_strided_slice %376 {offsets = [3, 0], sizes = [1, 128], strides = [1, 1]} : vector<4x128xf32> to vector<1x128xf32>
    %400 = vector.broadcast %398 : vector<4x1xf32> to vector<4x128xf32>
    %401 = vector.broadcast %399 : vector<1x128xf32> to vector<4x128xf32>
    %402 = arith.mulf %400, %401 : vector<4x128xf32>
    %403 = arith.addf %397, %402 : vector<4x128xf32>
    %404 = arith.addf %375, %403 : vector<4x128xf32>
    %c0_99 = arith.constant 0 : index
    %c33 = arith.constant 33 : index
    %405 = vector.load %arg12[%c0_99, %c33] : memref<4x192xf32, #tpu.memory_space<vmem>>, vector<4x128xf32>
    %c15_i32_100 = arith.constant 15 : i32
    %406 = vector.broadcast %c15_i32_100 : i32 to vector<1x128xi32>
    %407 = arith.cmpi ne, %240, %406 : vector<1x128xi32>
    %cst_101 = arith.constant 0.000000e+00 : f32
    %408 = vector.shape_cast %407 : vector<1x128xi1> to vector<1x128xi1>
    %409 = vector.broadcast %408 : vector<1x128xi1> to vector<4x128xi1>
    %410 = vector.broadcast %cst_101 : f32 to vector<4x128xf32>
    %411 = arith.select %409, %405, %410 : vector<4x128xi1>, vector<4x128xf32>
    %c5_102 = arith.constant 5 : index
    %c0_103 = arith.constant 0 : index
    %c0_104 = arith.constant 0 : index
    %412 = vector.load %arg6[%c5_102, %c0_103, %c0_104] : memref<9x4x4xf32, #tpu.memory_space<vmem>>, vector<1x4x4xf32>
    %413 = vector.shape_cast %412 : vector<1x4x4xf32> to vector<4x4xf32>
    %cst_105 = arith.constant 0.000000e+00 : f32
    %414 = vector.broadcast %cst_105 : f32 to vector<4x128xf32>
    %415 = vector.extract_strided_slice %413 {offsets = [0, 0], sizes = [4, 1], strides = [1, 1]} : vector<4x4xf32> to vector<4x1xf32>
    %416 = vector.extract_strided_slice %411 {offsets = [0, 0], sizes = [1, 128], strides = [1, 1]} : vector<4x128xf32> to vector<1x128xf32>
    %417 = vector.broadcast %415 : vector<4x1xf32> to vector<4x128xf32>
    %418 = vector.broadcast %416 : vector<1x128xf32> to vector<4x128xf32>
    %419 = arith.mulf %417, %418 : vector<4x128xf32>
    %420 = arith.addf %414, %419 : vector<4x128xf32>
    %421 = vector.extract_strided_slice %413 {offsets = [0, 1], sizes = [4, 1], strides = [1, 1]} : vector<4x4xf32> to vector<4x1xf32>
    %422 = vector.extract_strided_slice %411 {offsets = [1, 0], sizes = [1, 128], strides = [1, 1]} : vector<4x128xf32> to vector<1x128xf32>
    %423 = vector.broadcast %421 : vector<4x1xf32> to vector<4x128xf32>
    %424 = vector.broadcast %422 : vector<1x128xf32> to vector<4x128xf32>
    %425 = arith.mulf %423, %424 : vector<4x128xf32>
    %426 = arith.addf %420, %425 : vector<4x128xf32>
    %427 = vector.extract_strided_slice %413 {offsets = [0, 2], sizes = [4, 1], strides = [1, 1]} : vector<4x4xf32> to vector<4x1xf32>
    %428 = vector.extract_strided_slice %411 {offsets = [2, 0], sizes = [1, 128], strides = [1, 1]} : vector<4x128xf32> to vector<1x128xf32>
    %429 = vector.broadcast %427 : vector<4x1xf32> to vector<4x128xf32>
    %430 = vector.broadcast %428 : vector<1x128xf32> to vector<4x128xf32>
    %431 = arith.mulf %429, %430 : vector<4x128xf32>
    %432 = arith.addf %426, %431 : vector<4x128xf32>
    %433 = vector.extract_strided_slice %413 {offsets = [0, 3], sizes = [4, 1], strides = [1, 1]} : vector<4x4xf32> to vector<4x1xf32>
    %434 = vector.extract_strided_slice %411 {offsets = [3, 0], sizes = [1, 128], strides = [1, 1]} : vector<4x128xf32> to vector<1x128xf32>
    %435 = vector.broadcast %433 : vector<4x1xf32> to vector<4x128xf32>
    %436 = vector.broadcast %434 : vector<1x128xf32> to vector<4x128xf32>
    %437 = arith.mulf %435, %436 : vector<4x128xf32>
    %438 = arith.addf %432, %437 : vector<4x128xf32>
    %439 = arith.addf %404, %438 : vector<4x128xf32>
    %c0_106 = arith.constant 0 : index
    %c47 = arith.constant 47 : index
    %440 = vector.load %arg12[%c0_106, %c47] : memref<4x192xf32, #tpu.memory_space<vmem>>, vector<4x128xf32>
    %c0_i32_107 = arith.constant 0 : i32
    %441 = vector.broadcast %c0_i32_107 : i32 to vector<1x128xi32>
    %442 = arith.cmpi ne, %240, %441 : vector<1x128xi32>
    %cst_108 = arith.constant 0.000000e+00 : f32
    %443 = vector.shape_cast %442 : vector<1x128xi1> to vector<1x128xi1>
    %444 = vector.broadcast %443 : vector<1x128xi1> to vector<4x128xi1>
    %445 = vector.broadcast %cst_108 : f32 to vector<4x128xf32>
    %446 = arith.select %444, %440, %445 : vector<4x128xi1>, vector<4x128xf32>
    %c6 = arith.constant 6 : index
    %c0_109 = arith.constant 0 : index
    %c0_110 = arith.constant 0 : index
    %447 = vector.load %arg6[%c6, %c0_109, %c0_110] : memref<9x4x4xf32, #tpu.memory_space<vmem>>, vector<1x4x4xf32>
    %448 = vector.shape_cast %447 : vector<1x4x4xf32> to vector<4x4xf32>
    %cst_111 = arith.constant 0.000000e+00 : f32
    %449 = vector.broadcast %cst_111 : f32 to vector<4x128xf32>
    %450 = vector.extract_strided_slice %448 {offsets = [0, 0], sizes = [4, 1], strides = [1, 1]} : vector<4x4xf32> to vector<4x1xf32>
    %451 = vector.extract_strided_slice %446 {offsets = [0, 0], sizes = [1, 128], strides = [1, 1]} : vector<4x128xf32> to vector<1x128xf32>
    %452 = vector.broadcast %450 : vector<4x1xf32> to vector<4x128xf32>
    %453 = vector.broadcast %451 : vector<1x128xf32> to vector<4x128xf32>
    %454 = arith.mulf %452, %453 : vector<4x128xf32>
    %455 = arith.addf %449, %454 : vector<4x128xf32>
    %456 = vector.extract_strided_slice %448 {offsets = [0, 1], sizes = [4, 1], strides = [1, 1]} : vector<4x4xf32> to vector<4x1xf32>
    %457 = vector.extract_strided_slice %446 {offsets = [1, 0], sizes = [1, 128], strides = [1, 1]} : vector<4x128xf32> to vector<1x128xf32>
    %458 = vector.broadcast %456 : vector<4x1xf32> to vector<4x128xf32>
    %459 = vector.broadcast %457 : vector<1x128xf32> to vector<4x128xf32>
    %460 = arith.mulf %458, %459 : vector<4x128xf32>
    %461 = arith.addf %455, %460 : vector<4x128xf32>
    %462 = vector.extract_strided_slice %448 {offsets = [0, 2], sizes = [4, 1], strides = [1, 1]} : vector<4x4xf32> to vector<4x1xf32>
    %463 = vector.extract_strided_slice %446 {offsets = [2, 0], sizes = [1, 128], strides = [1, 1]} : vector<4x128xf32> to vector<1x128xf32>
    %464 = vector.broadcast %462 : vector<4x1xf32> to vector<4x128xf32>
    %465 = vector.broadcast %463 : vector<1x128xf32> to vector<4x128xf32>
    %466 = arith.mulf %464, %465 : vector<4x128xf32>
    %467 = arith.addf %461, %466 : vector<4x128xf32>
    %468 = vector.extract_strided_slice %448 {offsets = [0, 3], sizes = [4, 1], strides = [1, 1]} : vector<4x4xf32> to vector<4x1xf32>
    %469 = vector.extract_strided_slice %446 {offsets = [3, 0], sizes = [1, 128], strides = [1, 1]} : vector<4x128xf32> to vector<1x128xf32>
    %470 = vector.broadcast %468 : vector<4x1xf32> to vector<4x128xf32>
    %471 = vector.broadcast %469 : vector<1x128xf32> to vector<4x128xf32>
    %472 = arith.mulf %470, %471 : vector<4x128xf32>
    %473 = arith.addf %467, %472 : vector<4x128xf32>
    %474 = arith.addf %439, %473 : vector<4x128xf32>
    %c0_112 = arith.constant 0 : index
    %c48 = arith.constant 48 : index
    %475 = vector.load %arg12[%c0_112, %c48] : memref<4x192xf32, #tpu.memory_space<vmem>>, vector<4x128xf32>
    %c7 = arith.constant 7 : index
    %c0_113 = arith.constant 0 : index
    %c0_114 = arith.constant 0 : index
    %476 = vector.load %arg6[%c7, %c0_113, %c0_114] : memref<9x4x4xf32, #tpu.memory_space<vmem>>, vector<1x4x4xf32>
    %477 = vector.shape_cast %476 : vector<1x4x4xf32> to vector<4x4xf32>
    %cst_115 = arith.constant 0.000000e+00 : f32
    %478 = vector.broadcast %cst_115 : f32 to vector<4x128xf32>
    %479 = vector.extract_strided_slice %477 {offsets = [0, 0], sizes = [4, 1], strides = [1, 1]} : vector<4x4xf32> to vector<4x1xf32>
    %480 = vector.extract_strided_slice %475 {offsets = [0, 0], sizes = [1, 128], strides = [1, 1]} : vector<4x128xf32> to vector<1x128xf32>
    %481 = vector.broadcast %479 : vector<4x1xf32> to vector<4x128xf32>
    %482 = vector.broadcast %480 : vector<1x128xf32> to vector<4x128xf32>
    %483 = arith.mulf %481, %482 : vector<4x128xf32>
    %484 = arith.addf %478, %483 : vector<4x128xf32>
    %485 = vector.extract_strided_slice %477 {offsets = [0, 1], sizes = [4, 1], strides = [1, 1]} : vector<4x4xf32> to vector<4x1xf32>
    %486 = vector.extract_strided_slice %475 {offsets = [1, 0], sizes = [1, 128], strides = [1, 1]} : vector<4x128xf32> to vector<1x128xf32>
    %487 = vector.broadcast %485 : vector<4x1xf32> to vector<4x128xf32>
    %488 = vector.broadcast %486 : vector<1x128xf32> to vector<4x128xf32>
    %489 = arith.mulf %487, %488 : vector<4x128xf32>
    %490 = arith.addf %484, %489 : vector<4x128xf32>
    %491 = vector.extract_strided_slice %477 {offsets = [0, 2], sizes = [4, 1], strides = [1, 1]} : vector<4x4xf32> to vector<4x1xf32>
    %492 = vector.extract_strided_slice %475 {offsets = [2, 0], sizes = [1, 128], strides = [1, 1]} : vector<4x128xf32> to vector<1x128xf32>
    %493 = vector.broadcast %491 : vector<4x1xf32> to vector<4x128xf32>
    %494 = vector.broadcast %492 : vector<1x128xf32> to vector<4x128xf32>
    %495 = arith.mulf %493, %494 : vector<4x128xf32>
    %496 = arith.addf %490, %495 : vector<4x128xf32>
    %497 = vector.extract_strided_slice %477 {offsets = [0, 3], sizes = [4, 1], strides = [1, 1]} : vector<4x4xf32> to vector<4x1xf32>
    %498 = vector.extract_strided_slice %475 {offsets = [3, 0], sizes = [1, 128], strides = [1, 1]} : vector<4x128xf32> to vector<1x128xf32>
    %499 = vector.broadcast %497 : vector<4x1xf32> to vector<4x128xf32>
    %500 = vector.broadcast %498 : vector<1x128xf32> to vector<4x128xf32>
    %501 = arith.mulf %499, %500 : vector<4x128xf32>
    %502 = arith.addf %496, %501 : vector<4x128xf32>
    %503 = arith.addf %474, %502 : vector<4x128xf32>
    %c0_116 = arith.constant 0 : index
    %c49 = arith.constant 49 : index
    %504 = vector.load %arg12[%c0_116, %c49] : memref<4x192xf32, #tpu.memory_space<vmem>>, vector<4x128xf32>
    %c15_i32_117 = arith.constant 15 : i32
    %505 = vector.broadcast %c15_i32_117 : i32 to vector<1x128xi32>
    %506 = arith.cmpi ne, %240, %505 : vector<1x128xi32>
    %cst_118 = arith.constant 0.000000e+00 : f32
    %507 = vector.shape_cast %506 : vector<1x128xi1> to vector<1x128xi1>
    %508 = vector.broadcast %507 : vector<1x128xi1> to vector<4x128xi1>
    %509 = vector.broadcast %cst_118 : f32 to vector<4x128xf32>
    %510 = arith.select %508, %504, %509 : vector<4x128xi1>, vector<4x128xf32>
    %c8 = arith.constant 8 : index
    %c0_119 = arith.constant 0 : index
    %c0_120 = arith.constant 0 : index
    %511 = vector.load %arg6[%c8, %c0_119, %c0_120] : memref<9x4x4xf32, #tpu.memory_space<vmem>>, vector<1x4x4xf32>
    %512 = vector.shape_cast %511 : vector<1x4x4xf32> to vector<4x4xf32>
    %cst_121 = arith.constant 0.000000e+00 : f32
    %513 = vector.broadcast %cst_121 : f32 to vector<4x128xf32>
    %514 = vector.extract_strided_slice %512 {offsets = [0, 0], sizes = [4, 1], strides = [1, 1]} : vector<4x4xf32> to vector<4x1xf32>
    %515 = vector.extract_strided_slice %510 {offsets = [0, 0], sizes = [1, 128], strides = [1, 1]} : vector<4x128xf32> to vector<1x128xf32>
    %516 = vector.broadcast %514 : vector<4x1xf32> to vector<4x128xf32>
    %517 = vector.broadcast %515 : vector<1x128xf32> to vector<4x128xf32>
    %518 = arith.mulf %516, %517 : vector<4x128xf32>
    %519 = arith.addf %513, %518 : vector<4x128xf32>
    %520 = vector.extract_strided_slice %512 {offsets = [0, 1], sizes = [4, 1], strides = [1, 1]} : vector<4x4xf32> to vector<4x1xf32>
    %521 = vector.extract_strided_slice %510 {offsets = [1, 0], sizes = [1, 128], strides = [1, 1]} : vector<4x128xf32> to vector<1x128xf32>
    %522 = vector.broadcast %520 : vector<4x1xf32> to vector<4x128xf32>
    %523 = vector.broadcast %521 : vector<1x128xf32> to vector<4x128xf32>
    %524 = arith.mulf %522, %523 : vector<4x128xf32>
    %525 = arith.addf %519, %524 : vector<4x128xf32>
    %526 = vector.extract_strided_slice %512 {offsets = [0, 2], sizes = [4, 1], strides = [1, 1]} : vector<4x4xf32> to vector<4x1xf32>
    %527 = vector.extract_strided_slice %510 {offsets = [2, 0], sizes = [1, 128], strides = [1, 1]} : vector<4x128xf32> to vector<1x128xf32>
    %528 = vector.broadcast %526 : vector<4x1xf32> to vector<4x128xf32>
    %529 = vector.broadcast %527 : vector<1x128xf32> to vector<4x128xf32>
    %530 = arith.mulf %528, %529 : vector<4x128xf32>
    %531 = arith.addf %525, %530 : vector<4x128xf32>
    %532 = vector.extract_strided_slice %512 {offsets = [0, 3], sizes = [4, 1], strides = [1, 1]} : vector<4x4xf32> to vector<4x1xf32>
    %533 = vector.extract_strided_slice %510 {offsets = [3, 0], sizes = [1, 128], strides = [1, 1]} : vector<4x128xf32> to vector<1x128xf32>
    %534 = vector.broadcast %532 : vector<4x1xf32> to vector<4x128xf32>
    %535 = vector.broadcast %533 : vector<1x128xf32> to vector<4x128xf32>
    %536 = arith.mulf %534, %535 : vector<4x128xf32>
    %537 = arith.addf %531, %536 : vector<4x128xf32>
    %538 = arith.addf %503, %537 : vector<4x128xf32>
    %c0_122 = arith.constant 0 : index
    %c0_123 = arith.constant 0 : index
    %539 = vector.load %arg7[%c0_122, %c0_123] : memref<4x1xf32, #tpu.memory_space<vmem>>, vector<4x1xf32>
    %540 = vector.broadcast %539 : vector<4x1xf32> to vector<4x128xf32>
    %541 = arith.addf %538, %540 : vector<4x128xf32>
    %c0_124 = arith.constant 0 : index
    %c0_125 = arith.constant 0 : index
    %542 = vector.load %arg8[%c0_124, %c0_125] : memref<4x4xf32, #tpu.memory_space<vmem>>, vector<4x4xf32>
    %c0_126 = arith.constant 0 : index
    %c0_127 = arith.constant 0 : index
    %543 = vector.load %arg9[%c0_126, %c0_127] : memref<4x1xf32, #tpu.memory_space<vmem>>, vector<4x1xf32>
    %cst_128 = arith.constant 0.000000e+00 : f32
    %544 = vector.broadcast %cst_128 : f32 to vector<4x128xf32>
    %545 = vector.extract_strided_slice %542 {offsets = [0, 0], sizes = [4, 1], strides = [1, 1]} : vector<4x4xf32> to vector<4x1xf32>
    %546 = vector.extract_strided_slice %541 {offsets = [0, 0], sizes = [1, 128], strides = [1, 1]} : vector<4x128xf32> to vector<1x128xf32>
    %547 = vector.broadcast %545 : vector<4x1xf32> to vector<4x128xf32>
    %548 = vector.broadcast %546 : vector<1x128xf32> to vector<4x128xf32>
    %549 = arith.mulf %547, %548 : vector<4x128xf32>
    %550 = arith.addf %544, %549 : vector<4x128xf32>
    %551 = vector.extract_strided_slice %542 {offsets = [0, 1], sizes = [4, 1], strides = [1, 1]} : vector<4x4xf32> to vector<4x1xf32>
    %552 = vector.extract_strided_slice %541 {offsets = [1, 0], sizes = [1, 128], strides = [1, 1]} : vector<4x128xf32> to vector<1x128xf32>
    %553 = vector.broadcast %551 : vector<4x1xf32> to vector<4x128xf32>
    %554 = vector.broadcast %552 : vector<1x128xf32> to vector<4x128xf32>
    %555 = arith.mulf %553, %554 : vector<4x128xf32>
    %556 = arith.addf %550, %555 : vector<4x128xf32>
    %557 = vector.extract_strided_slice %542 {offsets = [0, 2], sizes = [4, 1], strides = [1, 1]} : vector<4x4xf32> to vector<4x1xf32>
    %558 = vector.extract_strided_slice %541 {offsets = [2, 0], sizes = [1, 128], strides = [1, 1]} : vector<4x128xf32> to vector<1x128xf32>
    %559 = vector.broadcast %557 : vector<4x1xf32> to vector<4x128xf32>
    %560 = vector.broadcast %558 : vector<1x128xf32> to vector<4x128xf32>
    %561 = arith.mulf %559, %560 : vector<4x128xf32>
    %562 = arith.addf %556, %561 : vector<4x128xf32>
    %563 = vector.extract_strided_slice %542 {offsets = [0, 3], sizes = [4, 1], strides = [1, 1]} : vector<4x4xf32> to vector<4x1xf32>
    %564 = vector.extract_strided_slice %541 {offsets = [3, 0], sizes = [1, 128], strides = [1, 1]} : vector<4x128xf32> to vector<1x128xf32>
    %565 = vector.broadcast %563 : vector<4x1xf32> to vector<4x128xf32>
    %566 = vector.broadcast %564 : vector<1x128xf32> to vector<4x128xf32>
    %567 = arith.mulf %565, %566 : vector<4x128xf32>
    %568 = arith.addf %562, %567 : vector<4x128xf32>
    %569 = vector.broadcast %543 : vector<4x1xf32> to vector<4x128xf32>
    %570 = arith.addf %568, %569 : vector<4x128xf32>
    %cst_129 = arith.constant 0.000000e+00 : f32
    %571 = vector.broadcast %cst_129 : f32 to vector<4x128xf32>
    %572 = arith.subf %571, %570 : vector<4x128xf32>
    %573 = math.exp %572 : vector<4x128xf32>
    %cst_130 = arith.constant 1.000000e+00 : f32
    %574 = vector.broadcast %cst_130 : f32 to vector<4x128xf32>
    %575 = arith.addf %574, %573 : vector<4x128xf32>
    %cst_131 = arith.constant 1.000000e+00 : f32
    %576 = vector.broadcast %cst_131 : f32 to vector<4x128xf32>
    %577 = arith.divf %576, %575 : vector<4x128xf32>
    %578 = arith.mulf %541, %577 : vector<4x128xf32>
    %579 = arith.mulf %541, %578 : vector<4x128xf32>
    %c6_132 = arith.constant 6 : index
    %580 = memref.load %arg10[%c6_132] : memref<7xf32, #tpu.memory_space<smem>>
    %581 = vector.broadcast %580 : f32 to vector<4x128xf32>
    %582 = arith.mulf %581, %579 : vector<4x128xf32>
    %cst_133 = arith.constant 1.000000e+00 : f32
    %583 = arith.subf %cst_133, %580 : f32
    %584 = vector.broadcast %583 : f32 to vector<4x128xf32>
    %585 = arith.mulf %584, %1 : vector<4x128xf32>
    %586 = arith.addf %582, %585 : vector<4x128xf32>
    %c0_134 = arith.constant 0 : index
    %c0_135 = arith.constant 0 : index
    %c0_136 = arith.constant 0 : index
    %587 = vector.load %arg11[%c0_134, %c0_135, %c0_136] : memref<1x4x128xf32, #tpu.memory_space<vmem>>, vector<1x4x128xf32>
    %588 = vector.shape_cast %587 : vector<1x4x128xf32> to vector<4x128xf32>
    %589 = vector.shape_cast %586 : vector<4x128xf32> to vector<1x4x128xf32>
    tpu.vector_store %arg11[%c0_134, %c0_135, %c0_136], %589 {strides = array<i32>} : memref<1x4x128xf32, #tpu.memory_space<vmem>>, vector<1x4x128xf32>,
    return
  }
  func.func @transform_0(%arg0: i32, %arg1: i32) -> (i32, i32, i32) {
    %c0_i32 = arith.constant 0 : i32
    %c0_i32_0 = arith.constant 0 : i32
    return %arg0, %c0_i32, %arg1 : i32, i32, i32
  }
  func.func @transform_1(%arg0: i32, %arg1: i32) -> (i32, i32, i32, i32) {
    %c0_i32 = arith.constant 0 : i32
    %c0_i32_0 = arith.constant 0 : i32
    %c0_i32_1 = arith.constant 0 : i32
    return %arg0, %arg1, %c0_i32, %c0_i32_0 : i32, i32, i32, i32
  }
  func.func @transform_2(%arg0: i32, %arg1: i32) -> (i32, i32, i32) {
    %c0_i32 = arith.constant 0 : i32
    %c0_i32_0 = arith.constant 0 : i32
    %c0_i32_1 = arith.constant 0 : i32
    %c0_i32_2 = arith.constant 0 : i32
    return %c0_i32, %c0_i32_0, %c0_i32_1 : i32, i32, i32
  }
  func.func @transform_3(%arg0: i32, %arg1: i32) -> (i32, i32, i32) {
    %c0_i32 = arith.constant 0 : i32
    %c0_i32_0 = arith.constant 0 : i32
    %c0_i32_1 = arith.constant 0 : i32
    %c0_i32_2 = arith.constant 0 : i32
    return %c0_i32, %c0_i32_0, %c0_i32_1 : i32, i32, i32
  }
  func.func @transform_4(%arg0: i32, %arg1: i32) -> (i32, i32, i32) {
    %c0_i32 = arith.constant 0 : i32
    %c0_i32_0 = arith.constant 0 : i32
    %c0_i32_1 = arith.constant 0 : i32
    %c0_i32_2 = arith.constant 0 : i32
    return %c0_i32, %c0_i32_0, %c0_i32_1 : i32, i32, i32
  }
  func.func @transform_5(%arg0: i32, %arg1: i32) -> (i32, i32) {
    %c0_i32 = arith.constant 0 : i32
    %c0_i32_0 = arith.constant 0 : i32
    %c0_i32_1 = arith.constant 0 : i32
    return %c0_i32, %c0_i32_0 : i32, i32
  }
  func.func @transform_6(%arg0: i32, %arg1: i32) -> (i32, i32) {
    %c0_i32 = arith.constant 0 : i32
    %c0_i32_0 = arith.constant 0 : i32
    %c0_i32_1 = arith.constant 0 : i32
    return %c0_i32, %c0_i32_0 : i32, i32
  }
  func.func @transform_7(%arg0: i32, %arg1: i32) -> (i32, i32) {
    %c0_i32 = arith.constant 0 : i32
    %c0_i32_0 = arith.constant 0 : i32
    %c0_i32_1 = arith.constant 0 : i32
    return %c0_i32, %c0_i32_0 : i32, i32
  }
  func.func @transform_8(%arg0: i32, %arg1: i32) -> i32 {
    %c0_i32 = arith.constant 0 : i32
    %c0_i32_0 = arith.constant 0 : i32
    return %c0_i32 : i32
  }
  func.func @transform_9(%arg0: i32, %arg1: i32) -> (i32, i32, i32) {
    %c0_i32 = arith.constant 0 : i32
    %c0_i32_0 = arith.constant 0 : i32
    return %arg0, %c0_i32, %arg1 : i32, i32, i32
  }
}

</mosaic_0001>

<bundles_post_ra>
// kernel: tpu_custom_call.1
= control target key start
LH: loop header
LB: loop body
LE: loop exit
PB: predicated region body
PF: predicated region fallthrough
CT: control target
= control target key end

     0   :  { %s2444_s0 = inlined_call_operand.vmem [shape: f32[2,4,256], index: 0, kind: input, shape index: {}]   ;;  %s2445_s1 = inlined_call_operand.vmem [shape: f32[2,2,4,32], index: 1, kind: input, shape index: {}]   ;;  %s2446_s2 = inlined_call_operand.vmem [shape: f32[2,4,4], index: 2, kind: input, shape index: {}]   ;;  %s2447_s3 = inlined_call_operand.vmem [shape: f32[2,4,1], index: 3, kind: input, shape index: {}]   ;;  %s2448_s4 = inlined_call_operand.vmem [shape: f32[9,4,4], index: 4, kind: input, shape index: {}]   ;;  %s2449_s5 = inlined_call_operand.vmem [shape: f32[4,1], index: 5, kind: input, shape index: {}]   ;;  %s2450_s6 = inlined_call_operand.vmem [shape: f32[4,4], index: 6, kind: input, shape index: {}]   ;;  %s2451_s7 = inlined_call_operand.vmem [shape: f32[4,1], index: 7, kind: input, shape index: {}]   ;;  %s2452_s8 = inlined_call_operand.vmem [shape: f32[7], index: 8, kind: input, shape index: {}]   ;;  %s2453_s9 = inlined_call_operand.hbm [shape: f32[2,4,256], index: 9, kind: output, shape index: {}]  }
   0x1   :  { %2456 = sst [smem:[#allocation11_spill]] %s2444_s0 }
   0x2   :  { %2457 = sst [smem:[#allocation12_spill]] %s2446_s2 }
   0x3   :  { %14 = vsyncpa [#allocation5], 0 }
   0x4   :  { %15 = vsyncpa [#allocation4], 0 }
   0x5   :  { %17 = vsyncpa [#allocation4 + $0x1], 0  ;;  %s1918_s30 = smov 0   ;;  %s1920_s10 = smov 0  }
   0x6   :  { %s1922_s11 = smov 0   ;;  %s1924_s12 = smov 0  }
   0x7   :  { %s1926_s13 = smov 0   ;;  %s1928_s14 = smov 0  }
   0x8   :  { %s1930_s15 = smov 0   ;;  %s1932_s16 = smov 0  }
   0x9 LB: > { %2458 = sst [smem:[#allocation9_spill]] %s1840_s14  ;;  %s1540_s17 = sadd.s32 4294967295, %s1848_s16   ;;  %s1848_s16 = sphi %s1932_s16, %s23_s16   ;;  %s1844_s15 = sphi %s1930_s15, %s2478_s15   ;;  %s1840_s14 = sphi %s1928_s14, %s2477_s14   ;;  %s1836_s13 = sphi %s1926_s13, %s2476_s13   ;;  %s1832_s12 = sphi %s1924_s12, %s2471_s12   ;;  %s1828_s11 = sphi %s1922_s11, %s2475_s11   ;;  %s1824_s10 = sphi %s1920_s10, %s2474_s10   ;;  %s1820_s30 = sphi %s1918_s30, %s2473_s30  }
   0xa   : > { %s1541_s18 = sadd.s32 4294967294, %s1848_s16   ;;  %s32_s19 = sadd.s32 1, %s1840_s14 }
   0xb   : > { %s35_s20 = sadd.s32 1, %s1844_s15  ;;  %p33_p0 = scmp.ge.s32.totalorder %s32_s19, 2 }
   0xc   : > { %s247_s21 = sadd.s32 1, %s1828_s11  ;;  %p257_p1 = scmp.ne.s32.totalorder %s1828_s11, %s1824_s10 }
   0xd   : > { %p258_p2 = scmp.eq.s32.totalorder %s1540_s17, 3  ;;  %s2480_s19 = smov (%p33_p0, %s32_s19), 0 }
   0xe   : > { %2459 = sst [smem:[#allocation10_spill]] %s2480_s19  ;;  %s2482_s20 = smov (!%p33_p0, %s35_s20), %s1844_s15 }
   0xf   : > { %s243_s22 = ssub.s32 %s1840_s14, %s2480_s19  ;;  %p1970_p3 = por %p258_p2, %p257_p1 }
  0x10   : > { %p37_p4 = scmp.ge.s32.totalorder %s2482_s20, 2  ;;  %p263_p5 = scmp.ne.s32.totalorder %s1824_s10, %s1820_s30 }
  0x11   : > { %p264_p6 = scmp.eq.s32.totalorder %s1541_s18, 3  ;;  %p1542_p7 = scmp.ge.s32.totalorder %s1848_s16, 1 }
  0x12   : > { %s2484_s20 = smov (%p37_p4, %s2482_s20), 0  ;;  %p271_p9 = scmp.lt.s32.totalorder %s1848_s16, 5 }
  0x13   : > { %p1979_p8 = por %p264_p6, %p263_p5  ;;  %s242_s25 = ssub.s32 %s1844_s15, %s2484_s20 }
  0x14   : > { %s244_s26 = sor.u32 %s243_s22, %s242_s25  ;;  %p1986_p10 = pnand %p1542_p7, %p271_p9 }
  0x15   : > { %s2461_s24 = scalar_select %p1979_p8, 1, 0 }
  0x16   : > { %p245_p11 = scmp.eq.s32.totalorder %s244_s26, 0  ;;  %p1990_p12 = scmp.eq.s32.totalorder %s1540_s17, 0 }
  0x17   : > { %p1579_p13 = pneg %p1986_p10  ;;  %s302_s19 = sshll.u32 %s2452_s8, 4  ;;  %s303_s19 = int_to_ptr.vmem [resolvable:$true] %s302_s19 }
  0x18   : > { %s2000_s14 = scalar_select %p245_p11, %s1828_s11, %s247_s21  }
  0x19   : > { %p1580_p0 = pnand %p1990_p12, %p1579_p13  ;;  %s1735_s22 = scalar_lea.vmem %s303_s19, 16 }
  0x1a   : > { %p1736_p1 = scmp.ne.s32.totalorder %s303_s19, %s1735_s22  ;;  %p1743_p6 = scmp.lt.s32.totalorder %s303_s19, %s303_s19 }
  0x1b   : > { %p1737_p2 = pneg %p1580_p0  ;;  %p1744_p7 = scmp.lt.s32.totalorder %s1735_s22, %s1735_s22 }
  0x1d   : > { %p1738_p4 = pnand %p1737_p2, %p1736_p1  ;;  %p1745_p9 = por %p1744_p7, %p1743_p6 }
  0x1f   : > { %p1739_p5 = pneg %p1738_p4 }
  0x21   : > { %p1746_p8 = pnand %p1745_p9, %p1739_p5 }
  0x23   : > { %1749 = shalt.err (!%p1746_p8)
}
  0x24   : > { %s1850_s17 = smov [#allocation3]   ;;  %337 = sbr.rel (%p1986_p10) target bundleno = 646 (0x286), region = 56 }
  0x25   : > { %1582 = dma.vmem_to_smem (!%p1580_p0), %s303_s19, 16, %s1850_s17, [#allocation5]  }
  0x2b   : > { %1811 = dma.done.wait (%p1990_p12), [#allocation5], 16  }
  0x2c   : > { %1813 = vsyncadd (%p1990_p12), [#allocation5], 4294967280 }
  0x2d   : > { %343 = sfence }
  0x2e   : > { %s2464_s2 = sld [smem:[#allocation12_spill]]  ;;  %v1851_v1 = vmov 0   ;;  %v1852_v2 = vmov 2   ;;  %v1853_v3 = vmov 1   ;;  %v1854_v4 = vmov 3   ;;  %p385_p8 = scmp.lt.s32.totalorder %s1836_s13, 1 }
  0x2f   : > { %1671 = vset.pattern.permute.xlu0 %v1851_v1  ;;  %1673 = vset.pattern.permute.xlu1 %v1852_v2  ;;  %v404_v5 = vld [vmem:[%s2447_s3] sm:$0xf]  ;;  %v1555_v7 = vld [vmem:[%s2447_s3 + $0x4] sm:$0xf]  ;;  %v2049_v10 = vld [vmem:[%s2448_s4 + $0x10] sm:$0xf]  ;;  %v410_v12 = vlaneseq }
  0x30   : > { %v2036_v8 = vld [vmem:[%s2448_s4] sm:$0xf]  ;;  %v1559_v9 = vld [vmem:[%s2448_s4 + $0x4] sm:$0xf]  ;;  %v2060_v11 = vld [vmem:[%s2448_s4 + $0x1c] sm:$0xf] }
  0x31   : > { %p387_p10 = scmp.lt.s32.totalorder %s1832_s12, 1  ;;  %v2070_v13 = vshrl.u32 %v410_v12, 7  ;;  %s2465_s0 = sld [smem:[#allocation11_spill]]  ;;  %vm621_vm0 = vcmask 125952   ;;  %vm636_vm1 = vcmask 1043712   ;;  %vm637_vm2 = vcmask 261124  }
  0x32   : > { %s386_s29 = scalar_select %p385_p8, %s1836_s13, 1  ;;  %vm627_vm3 = vcmask 257152   ;;  %vm633_vm4 = vcmask 261120   ;;  %vm638_vm5 = vmor %vm637_vm2, %vm636_vm1  ;;  %vm640_vm6 = vcmask 388352   ;;  %vm642_vm7 = vcmask 519552  }
  0x33   : > { %s388_s18 = scalar_select %p387_p10, %s1832_s12, 1  ;;  %v2079_v14 = vsub.s32 0, %v2070_v13  ;;  %v2082_v15 = vsub.s32 1, %v2070_v13  ;;  %v2089_v18 = vsub.s32 2, %v2070_v13  ;;  %v2092_v21 = vsub.s32 3, %v2070_v13 }
  0x34   : > { %v403_v0 = vld [vmem:[%s2464_s2] sm:$0xf]  ;;  %v1554_v6 = vld [vmem:[%s2464_s2 + $0x4] sm:$0xf]  ;;  %s1548_s22 = sshll.u32 %s386_s29, 1  ;;  %s1553_s29 = sld [smem:[#allocation3 + $0x2]] }
  0x35   : > { %407 = vperm.xlu0 %1671, %v403_v0   ;;  %427 = vperm.xlu1 %1673, %v403_v0   ;;  %s390_s17 = sadd.s32 %s1548_s22, %s388_s18  ;;  %s1552_s18 = sld [smem:[#allocation3 + $0x1]]  ;;  %vm668_vm8 = vcmask 924672   ;;  %vm842_vm9 = vcmask 908288   ;;  %vm897_vm12 = vcmask 793600   ;;  %vm1069_vm13 = vcmask 777216  }
  0x36   : > { %s1549_s21 = sshll.u32 %s390_s17, 2  ;;  %s1558_s17 = sld [smem:[#allocation3 + $0x5]]  ;;  %vm1124_vm14 = vcmask 662528   ;;  %vm1296_vm15 = vcmask 646144   ;;  %vm1060_vm1 = vcmask 785408   ;;  %vm1287_vm2 = vcmask 654336  }
  0x37   : > { %s392_s26 = scalar_lea.vmem %s2465_s0, %s1549_s21  ;;  %s400_s2 = scalar_lea.vmem %s2445_s1, %s1549_s21 }
  0x38   : > { %v2084_v16 = vld [vmem:[%s392_s26] sm:$0xf]  ;;  %s1556_s21 = sld [smem:[#allocation3 + $0x3]]  ;;  %s1557_s25 = sld [smem:[#allocation3 + $0x4]] }
  0x39   : > { %1672 = vset.pattern.permute.xlu0 %v1853_v3  ;;  %1674 = vset.pattern.permute.xlu1 %v1854_v4  ;;  %v2086_v17 = vld [vmem:[%s400_s2] sm:$0xf]  ;;  %v413_v22 = vrot.slane %v2084_v16, %v2079_v14  ;;  %v423_v24 = vrot.slane %v2084_v16, %v2082_v15  ;;  %v433_v26 = vrot.slane %v2084_v16, %v2089_v18  ;;  %s459_s2 = sld [smem:[#allocation3]]  ;;  %s1856_s26 = smov 32  }
  0x3a   : > { %417 = vperm.xlu0 %1672, %v403_v0   ;;  %437 = vperm.xlu1 %1674, %v403_v0   ;;  %v548_v23 = vrot.slane %v2086_v17, %v2079_v14  ;;  %v554_v25 = vrot.slane %v2086_v17, %v2082_v15  ;;  %v560_v27 = vrot.slane %v2086_v17, %v2089_v18  ;;  %s469_s22 = ssub.f32 1.0, %s1553_s29  ;;  %s1857_s27 = smov 16  }
  0x3b   : > { %v443_v28 = vrot.slane %v2084_v16, %v2092_v21  ;;  %v566_v29 = vrot.slane %v2086_v17, %v2092_v21  ;;  %v464_v59 = vstv %s1552_s18  ;;  %s1859_s28 = smov 113   ;;  %s1862_s18 = smov 79  }
  0x3c   : > { %v470_v63 = vstv %s469_s22  ;;  %s541_s19 = ssub.f32 1.0, %s1558_s17  ;;  %s1863_s22 = smov 81  }
  0x3e   : > { %1675 = vset.pattern.permute.xlu1 %v1851_v1  ;;  %1676 = vset.pattern.permute.xlu0 %v1851_v1 }
  0x3f   : > { %448 = vperm.xlu1 %1675, %v404_v5   ;;  %479 = vperm.xlu0 %1676, %v1554_v6   ;;  %v462_v57 = vstv %s459_s2  ;;  %s1860_s2 = smov 95  }
  0x40   : > { %v463_v62 = vmul.f32 %v462_v57, %v2084_v16  ;;  %v577_v5 = vmul.f32 %v462_v57, %v2086_v17 }
  0x43   : > { %1677 = vset.pattern.permute.xlu1 %v1853_v3  ;;  %1679 = vset.pattern.permute.xlu0 %v1854_v4 }
  0x44   : > { %489 = vperm.xlu1 %1677, %v1554_v6   ;;  %509 = vperm.xlu0 %1679, %v1554_v6  }
  0x48   : > { %1678 = vset.pattern.permute.xlu1 %v1852_v2  ;;  %1681 = vset.pattern.permute.xlu0 %v1851_v1 }
  0x49   : > { %499 = vperm.xlu1 %1678, %v1554_v6   ;;  %720 = vperm.xlu0 %1681, %v1559_v9  }
  0x4d   : > { %1680 = vset.pattern.permute.xlu1 %v1851_v1  ;;  %1684 = vset.pattern.permute.xlu0 %v1854_v4 }
  0x4e   : > { %520 = vperm.xlu1 %1680, %v1555_v7   ;;  %799 = vperm.xlu0 %1684, %v1559_v9   ;;  %v467_v7 = vstv %s1553_s29  ;;  %s1861_s29 = smov 97  }
  0x52   : > { %675 = vperm.xlu1 %1680, %v2036_v8   ;;  %1689 = vset.pattern.permute.xlu0 %v1853_v3 }
  0x56   : > { %1682 = vset.pattern.permute.xlu1 %v1853_v3 }
  0x57   : > { %747 = vperm.xlu1 %1682, %v1559_v9  }
  0x5b   : > { %1683 = vset.pattern.permute.xlu1 %v1852_v2 }
  0x5c   : > { %773 = vperm.xlu1 %1683, %v1559_v9  }
  0x60   : > { %1685 = vset.pattern.permute.xlu1 %v1851_v1 }
  0x61   : > { %950 = vperm.xlu1 %1685, %v2049_v10  }
  0x65   : > { %1686 = vset.pattern.permute.xlu1 %v1853_v3 }
  0x66   : > { %977 = vperm.xlu1 %1686, %v2049_v10  }
  0x6a   : > { %1687 = vset.pattern.permute.xlu1 %v1854_v4 }
  0x6b   : > { %1029 = vperm.xlu1 %1687, %v2049_v10  }
  0x6f   : > { %1688 = vset.pattern.permute.xlu1 %v1851_v1 }
  0x70   : > { %1177 = vperm.xlu1 %1688, %v2060_v11  }
  0x74   : > { %1690 = vset.pattern.permute.xlu1 %v1852_v2 }
  0xb4   : > { %v408_v19 = vpop.permute.xlu0 %407  ;;  %v428_v20 = vpop.permute.xlu1 %427 }
  0xb5   : > { %v414_v32 = vmul.f32 %v413_v22, %v408_v19  ;;  %v549_v33 = vmul.f32 %v548_v23, %v408_v19  ;;  %v434_v36 = vmul.f32 %v433_v26, %v428_v20  ;;  %v561_v37 = vmul.f32 %v560_v27, %v428_v20 }
  0xb6   : > { %v471_v20 = vmul.f32 %v470_v63, %v2084_v16  ;;  %v581_v23 = vmul.f32 %v470_v63, %v2086_v17 }
  0xb9   : > { %v418_v30 = vpop.permute.xlu0 %417  ;;  %v438_v31 = vpop.permute.xlu1 %437 }
  0xba   : > { %v424_v34 = vmul.f32 %v423_v24, %v418_v30  ;;  %v555_v35 = vmul.f32 %v554_v25, %v418_v30  ;;  %v444_v40 = vmul.f32 %v443_v28, %v438_v31  ;;  %v567_v41 = vmul.f32 %v566_v29, %v438_v31 }
  0xbc   : > { %v425_v38 = vadd.f32 %v424_v34, %v414_v32  ;;  %v556_v39 = vadd.f32 %v555_v35, %v549_v33 }
  0xbe   : > { %v435_v42 = vadd.f32 %v434_v36, %v425_v38  ;;  %v562_v43 = vadd.f32 %v561_v37, %v556_v39  ;;  %v449_v44 = vpop.permute.xlu1 %448  ;;  %v480_v27 = vpop.permute.xlu0 %479 }
  0xc0   : > { %v445_v45 = vadd.f32 %v444_v40, %v435_v42  ;;  %v568_v46 = vadd.f32 %v567_v41, %v562_v43 }
  0xc2   : > { %v451_v47 = vadd.f32 %v449_v44, %v445_v45  ;;  %v569_v48 = vadd.f32 %v568_v46, %v449_v44 }
  0xc3   : > { %v490_v24 = vpop.permute.xlu1 %489  ;;  %v510_v41 = vpop.permute.xlu0 %509 }
  0xc4   : > { %v452_v49 = vsub.f32 0.0, %v451_v47  ;;  %v570_v50 = vsub.f32 0.0, %v569_v48 }
  0xc6   : > { %v453_v51 = vmul.f32 1.442695, %v452_v49  ;;  %v571_v52 = vmul.f32 1.442695, %v570_v50  ;;  %v1855_v49 = vmov 0.0  }
  0xc7   : > { %622 = vst.msk [vmem:[#allocation2] sm:$0xf] %vm621_vm0, %v1855_v49  ;;  %vm830_vm0 = vcmask 916480  }
  0xc8   : > { %1715 = vpow2.f32 %v453_v51  ;;  %v500_v34 = vpop.permute.xlu1 %499 }
  0xc9   : > { %1717 = vpow2.f32 %v571_v52 }
  0xd2   : > { %v1716_v53 = vpop.eup %1715 }
  0xd3   : > { %v1718_v54 = vpop.eup %1717  ;;  %v455_v55 = vadd.f32 1.0, %v1716_v53  ;;  %v521_v53 = vpop.permute.xlu1 %520 }
  0xd4   : > { %v573_v56 = vadd.f32 1.0, %v1718_v54 }
  0xd5   : > { %1719 = vrcp.f32 %v455_v55 }
  0xd6   : > { %1721 = vrcp.f32 %v573_v56 }
  0xdf   : > { %v1720_v58 = vpop.eup %1719 }
  0xe0   : > { %v1722_v60 = vpop.eup %1721  ;;  %v458_v61 = vmul.f32 %v1720_v58, %v2084_v16 }
  0xe1   : > { %v576_v0 = vmul.f32 %v1722_v60, %v2086_v17 }
  0xe2   : > { %v465_v6 = vmul.f32 %v464_v59, %v458_v61 }
  0xe3   : > { %v578_v9 = vmul.f32 %v576_v0, %v464_v59 }
  0xe4   : > { %v466_v19 = vsub.f32 %v463_v62, %v465_v6  ;;  %v534_v6 = vstv %s1556_s21 }
  0xe5   : > { %v579_v22 = vsub.f32 %v577_v5, %v578_v9 }
  0xe6   : > { %v468_v25 = vmul.f32 %v467_v7, %v466_v19 }
  0xe7   : > { %v580_v26 = vmul.f32 %v579_v22, %v467_v7  ;;  %v536_v7 = vstv %s1557_s25  ;;  %s1569_s25 = sshll.u32 %s1836_s13, 1 }
  0xe8   : > { %v2116_v28 = vadd.f32 %v471_v20, %v468_v25  ;;  %v542_v25 = vstv %s541_s19  ;;  %s1865_s19 = smov 96  }
  0xe9   : > { %v2118_v29 = vadd.f32 %v581_v23, %v580_v26 }
  0xea   : > { %v495_v30 = vrot.slane %v2116_v28, %v2082_v15  ;;  %v485_v31 = vrot.slane %v2116_v28, %v2079_v14  ;;  %v505_v32 = vrot.slane %v2116_v28, %v2089_v18  ;;  %v515_v38 = vrot.slane %v2116_v28, %v2092_v21 }
  0xeb   : > { %v592_v17 = vrot.slane %v2118_v29, %v2082_v15  ;;  %v586_v33 = vrot.slane %v2118_v29, %v2079_v14  ;;  %v598_v35 = vrot.slane %v2118_v29, %v2089_v18  ;;  %v604_v42 = vrot.slane %v2118_v29, %v2092_v21 }
  0xec   : > { %v496_v36 = vmul.f32 %v495_v30, %v490_v24  ;;  %v486_v37 = vmul.f32 %v485_v31, %v480_v27  ;;  %v506_v44 = vmul.f32 %v505_v32, %v500_v34  ;;  %v516_v48 = vmul.f32 %v515_v38, %v510_v41 }
  0xed   : > { %v593_v39 = vmul.f32 %v592_v17, %v490_v24  ;;  %v587_v40 = vmul.f32 %v586_v33, %v480_v27  ;;  %v599_v46 = vmul.f32 %v598_v35, %v500_v34  ;;  %v605_v51 = vmul.f32 %v604_v42, %v510_v41 }
  0xee   : > { %v497_v43 = vadd.f32 %v496_v36, %v486_v37  ;;  %v535_v22 = vmul.f32 %v534_v6, %v2116_v28  ;;  %v539_v24 = vstv %s1558_s17  ;;  %v615_v26 = vmul.f32 %v2118_v29, %v534_v6  ;;  %v2182_v37 = vpop.permute.xlu1 %675  ;;  %s1864_s17 = smov 112  }
  0xef   : > { %v594_v45 = vadd.f32 %v593_v39, %v587_v40  ;;  %v543_v17 = vmul.f32 %v542_v25, %v2116_v28  ;;  %v619_v34 = vmul.f32 %v2118_v29, %v542_v25 }
  0xf0   : > { %v507_v47 = vadd.f32 %v506_v44, %v497_v43  ;;  %v721_v43 = vpop.permute.xlu0 %720 }
  0xf1   : > { %v600_v50 = vadd.f32 %v599_v46, %v594_v45 }
  0xf2   : > { %v517_v52 = vadd.f32 %v516_v48, %v507_v47  ;;  %v748_v38 = vpop.permute.xlu1 %747 }
  0xf3   : > { %v606_v54 = vadd.f32 %v605_v51, %v600_v50  ;;  %v730_v50 = vsub.s32 4, %v2070_v13 }
  0xf4   : > { %v523_v55 = vadd.f32 %v521_v53, %v517_v52  ;;  %v2196_v45 = vpop.permute.xlu0 %799  ;;  %v756_v52 = vsub.s32 5, %v2070_v13 }
  0xf5   : > { %v607_v56 = vadd.f32 %v606_v54, %v521_v53 }
  0xf6   : > { %v524_v57 = vsub.f32 0.0, %v523_v55  ;;  %v2186_v39 = vpop.permute.xlu1 %773 }
  0xf7   : > { %v608_v58 = vsub.f32 0.0, %v607_v56 }
  0xf8   : > { %v525_v59 = vmul.f32 1.442695, %v524_v57 }
  0xf9   : > { %v609_v60 = vmul.f32 1.442695, %v608_v58 }
  0xfa   : > { %1723 = vpow2.f32 %v525_v59  ;;  %v2188_v40 = vpop.permute.xlu1 %950 }
  0xfb   : > { %1725 = vpow2.f32 %v609_v60 }
  0xfe   : > { %v2190_v41 = vpop.permute.xlu1 %977 }
 0x102   : > { %v2192_v42 = vpop.permute.xlu1 %1029 }
 0x104   : > { %v1724_v61 = vpop.eup %1723 }
 0x105   : > { %v1726_v62 = vpop.eup %1725  ;;  %v527_v63 = vadd.f32 1.0, %v1724_v61 }
 0x106   : > { %v611_v0 = vadd.f32 1.0, %v1726_v62  ;;  %v2194_v44 = vpop.permute.xlu1 %1177  ;;  %v808_v62 = vsub.s32 7, %v2070_v13 }
 0x107   : > { %1727 = vrcp.f32 %v527_v63 }
 0x108   : > { %1729 = vrcp.f32 %v611_v0 }
 0x111   : > { %v1728_v5 = vpop.eup %1727 }
 0x112   : > { %v1730_v9 = vpop.eup %1729  ;;  %v530_v19 = vmul.f32 %v1728_v5, %v2116_v28  ;;  %v1560_v28 = vld [vmem:[%s2448_s4 + $0x8] sm:$0xf] }
 0x113   : > { %v614_v20 = vmul.f32 %v1730_v9, %v2118_v29  ;;  %v1566_v29 = vld [vmem:[%s2448_s4 + $0x20] sm:$0xf] }
 0x114   : > { %v537_v23 = vmul.f32 %v536_v7, %v530_v19 }
 0x115   : > { %v616_v27 = vmul.f32 %v614_v20, %v536_v7 }
 0x116   : > { %v538_v30 = vsub.f32 %v535_v22, %v537_v23 }
 0x117   : > { %v617_v31 = vsub.f32 %v615_v26, %v616_v27 }
 0x118   : > { %v540_v32 = vmul.f32 %v539_v24, %v538_v30 }
 0x119   : > { %v618_v33 = vmul.f32 %v617_v31, %v539_v24 }
 0x11a   : > { %v544_v35 = vadd.f32 %v543_v17, %v540_v32 }
 0x11b   : > { %v620_v36 = vadd.f32 %v619_v34, %v618_v33 }
 0x11c   : > { %630 = vrot.lane.b32.xlu1 %v544_v35, %s1856_s26 }
 0x11d   : > { %624 = vrot.lane.b32.xlu0 %v620_v36, %s1857_s27  ;;  %s1858_s27 = smov 111  }
 0x120   : > { %1230 = vperm.xlu1 %1690, %v2060_v11  }
 0x121   : > { %1204 = vperm.xlu0 %1689, %v2060_v11  }
 0x124   : > { %1691 = vset.pattern.permute.xlu1 %v1854_v4 }
 0x125   : > { %685 = vperm.xlu0 %1689, %v2036_v8   ;;  %1256 = vperm.xlu1 %1691, %v2060_v11   ;;  %v1563_v11 = vld [vmem:[%s2448_s4 + $0x14] sm:$0xf] }
 0x129   : > { %1692 = vset.pattern.permute.xlu0 %v1852_v2  ;;  %1693 = vset.pattern.permute.xlu1 %v1852_v2 }
 0x12a   : > { %1003 = vperm.xlu0 %1692, %v2049_v10   ;;  %695 = vperm.xlu1 %1693, %v2036_v8   ;;  %v1561_v10 = vld [vmem:[%s2448_s4 + $0xc] sm:$0xf] }
 0x12e   : > { %870 = vperm.xlu0 %1692, %v1560_v28   ;;  %1694 = vset.pattern.permute.xlu1 %v1851_v1 }
 0x12f   : > { %850 = vperm.xlu1 %1694, %v1560_v28  }
 0x132   : > { %1696 = vset.pattern.permute.xlu0 %v1854_v4 }
 0x133   : > { %1695 = vset.pattern.permute.xlu1 %v1853_v3  ;;  %705 = vperm.xlu0 %1696, %v2036_v8   ;;  %v1564_v8 = vld [vmem:[%s2448_s4 + $0x18] sm:$0xf] }
 0x134   : > { %860 = vperm.xlu1 %1695, %v1560_v28  }
 0x137   : > { %880 = vperm.xlu0 %1696, %v1560_v28  }
 0x138   : > { %1697 = vset.pattern.permute.xlu1 %v1851_v1 }
 0x139   : > { %905 = vperm.xlu1 %1697, %v1561_v10  }
 0x13b   : > { %1107 = vperm.xlu0 %1696, %v1563_v11  }
 0x13d   : > { %1698 = vset.pattern.permute.xlu1 %v1853_v3 }
 0x13e   : > { %915 = vperm.xlu1 %1698, %v1561_v10  }
 0x13f   : > { %1334 = vperm.xlu0 %1696, %v1566_v29  }
 0x142   : > { %1699 = vset.pattern.permute.xlu1 %v1852_v2 }
 0x143   : > { %925 = vperm.xlu1 %1699, %v1561_v10   ;;  %1708 = vset.pattern.permute.xlu0 %v1851_v1 }
 0x144   : > { %1077 = vperm.xlu0 %1708, %v1563_v11  }
 0x147   : > { %1700 = vset.pattern.permute.xlu1 %v1854_v4 }
 0x148   : > { %935 = vperm.xlu1 %1700, %v1561_v10   ;;  %1132 = vperm.xlu0 %1708, %v1564_v8  }
 0x14c   : > { %1701 = vset.pattern.permute.xlu1 %v1853_v3  ;;  %1304 = vperm.xlu0 %1708, %v1566_v29  }
 0x14d   : > { %1087 = vperm.xlu1 %1701, %v1563_v11  }
 0x151   : > { %1702 = vset.pattern.permute.xlu1 %v1852_v2 }
 0x152   : > { %1097 = vperm.xlu1 %1702, %v1563_v11  }
 0x156   : > { %1703 = vset.pattern.permute.xlu1 %v1853_v3 }
 0x157   : > { %1142 = vperm.xlu1 %1703, %v1564_v8  }
 0x15b   : > { %1704 = vset.pattern.permute.xlu1 %v1852_v2 }
 0x15c   : > { %1152 = vperm.xlu1 %1704, %v1564_v8  }
 0x160   : > { %1705 = vset.pattern.permute.xlu1 %v1854_v4 }
 0x161   : > { %1162 = vperm.xlu1 %1705, %v1564_v8  }
 0x165   : > { %1706 = vset.pattern.permute.xlu1 %v1853_v3 }
 0x166   : > { %1314 = vperm.xlu1 %1706, %v1566_v29  }
 0x16a   : > { %1707 = vset.pattern.permute.xlu1 %v1852_v2 }
 0x16b   : > { %1324 = vperm.xlu1 %1707, %v1566_v29  }
 0x16f   : > { %1709 = vset.pattern.permute.xlu1 %v1853_v3 }
 0x18e   : > { %v631_v46 = vpop.permute.xlu1 %630 }
 0x18f   : > { %v625_v47 = vpop.permute.xlu0 %624  ;;  %v632_v3 = vrot.slane %v631_v46, 4 }
 0x190   : > { %628 = vst.msk [vmem:[#allocation2] sm:$0xf] %vm627_vm3, %v625_v47 }
 0x191   : > { %v634_v48 = vsel %vm633_vm4, %v632_v3, %v631_v46 }
 0x192   : > { %639 = vst.msk [vmem:[#allocation2] sm:$0xff] %vm638_vm5, %v634_v48 }
 0x193   : > { %641 = vst.msk [vmem:[#allocation2 + $0x4] sm:$0xf] %vm640_vm6, %v625_v47 }
 0x194   : > { %643 = vst.msk [vmem:[#allocation2 + $0x4] sm:$0xf] %vm642_vm7, %v1855_v49  ;;  %v782_v49 = vsub.s32 6, %v2070_v13 }
 0x19b   : > { %v715_v51 = vld [vmem:[#allocation2] sm:$0xff] }
 0x19c   : > { %838 = vrot.lane.b32.xlu0 %v715_v51, %s1858_s27  ;;  %664 = vrot.lane.b32.xlu1 %v715_v51, %s1859_s28  ;;  %v1184_v53 = vrot.slane %v715_v51, %v2079_v14  ;;  %v1188_v54 = vrot.slane %v715_v51, %v730_v50  ;;  %v1210_v55 = vrot.slane %v715_v51, %v2082_v15 }
 0x19d   : > { %v1214_v56 = vrot.slane %v715_v51, %v756_v52  ;;  %v1236_v63 = vrot.slane %v715_v51, %v2089_v18  ;;  %v1240_v0 = vrot.slane %v715_v51, %v782_v49  ;;  %v663_v6 = vcombine.high %v715_v51, %v715_v51 }
 0x19e   : > { %v1194_v58 = vrot.slane %v1184_v53, %v2079_v14  ;;  %v1198_v59 = vrot.slane %v1188_v54, %v2079_v14  ;;  %v1220_v60 = vrot.slane %v1210_v55, %v2082_v15  ;;  %v1262_v20 = vrot.slane %v715_v51, %v2092_v21 }
 0x19f   : > { %v1224_v61 = vrot.slane %v1214_v56, %v2082_v15  ;;  %v1266_v22 = vrot.slane %v715_v51, %v808_v62  ;;  %v1246_v13 = vrot.slane %v1236_v63, %v2089_v18  ;;  %v1250_v24 = vrot.slane %v1240_v0, %v2089_v18  ;;  %v1231_v29 = vpop.permute.xlu1 %1230 }
 0x1a0   : > { %v2205_v57 = vpop.permute.xlu0 %1204  ;;  %1065 = vrot.lane.b32.xlu0 %v715_v51, %s1860_s2  ;;  %893 = vrot.lane.b32.xlu1 %v715_v51, %s1861_s29  ;;  %v742_v7 = vmul.f32 %v1194_v58, %v721_v43  ;;  %v768_v9 = vmul.f32 %v1220_v60, %v748_v38  ;;  %v743_v19 = vmul.f32 %v1198_v59, %v721_v43 }
 0x1a1   : > { %v769_v23 = vmul.f32 %v1224_v61, %v748_v38  ;;  %v1272_v27 = vrot.slane %v1262_v20, %v2092_v21  ;;  %v1276_v30 = vrot.slane %v1266_v22, %v2092_v21  ;;  %v972_v32 = vmul.f32 %v1194_v58, %v2188_v40 }
 0x1a2   : > { %v770_v25 = vadd.f32 %v768_v9, %v742_v7  ;;  %v998_v17 = vmul.f32 %v1220_v60, %v2190_v41  ;;  %v794_v33 = vmul.f32 %v1246_v13, %v2186_v39  ;;  %v795_v34 = vmul.f32 %v1250_v24, %v2186_v39 }
 0x1a3   : > { %v771_v26 = vadd.f32 %v769_v23, %v743_v19  ;;  %v973_v10 = vmul.f32 %v1198_v59, %v2188_v40  ;;  %v999_v11 = vmul.f32 %v1224_v61, %v2190_v41  ;;  %v820_v38 = vmul.f32 %v1272_v27, %v2196_v45 }
 0x1a4   : > { %1292 = vrot.lane.b32.xlu0 %v715_v51, %s1862_s18  ;;  %1120 = vrot.lane.b32.xlu1 %v715_v51, %s1863_s22  ;;  %v2218_v5 = vpop.permute.xlu0 %685  ;;  %v796_v36 = vadd.f32 %v794_v33, %v770_v25  ;;  %v1000_v8 = vadd.f32 %v998_v17, %v972_v32  ;;  %v821_v43 = vmul.f32 %v1276_v30, %v2196_v45  ;;  %v1344_v45 = vld [vmem:[%s2449_s5] sm:$0xf]  ;;  %v1257_v54 = vpop.permute.xlu1 %1256 }
 0x1a5   : > { %v797_v28 = vadd.f32 %v795_v34, %v771_v26  ;;  %v1199_v46 = vmul.f32 %v1194_v58, %v2194_v44  ;;  %v1225_v39 = vmul.f32 %v1220_v60, %v2205_v57  ;;  %v1001_v50 = vadd.f32 %v999_v11, %v973_v10 }
 0x1a6   : > { %v822_v48 = vadd.f32 %v820_v38, %v796_v36  ;;  %v1050_v41 = vmul.f32 %v1272_v27, %v2192_v42  ;;  %v1200_v51 = vmul.f32 %v1198_v59, %v2194_v44  ;;  %v1226_v52 = vmul.f32 %v1224_v61, %v2205_v57  ;;  %v1351_v44 = vld [vmem:[%s2450_s6] sm:$0xf] }
 0x1a7   : > { %v823_v40 = vadd.f32 %v821_v43, %v797_v28  ;;  %v1227_v53 = vadd.f32 %v1225_v39, %v1199_v46  ;;  %v1251_v49 = vmul.f32 %v1246_v13, %v1231_v29  ;;  %v1051_v58 = vmul.f32 %v1276_v30, %v2192_v42 }
 0x1a8   : > { %840 = vrot.lane.b32.xlu1 %v663_v6, %s1858_s27  ;;  %666 = vrot.lane.b32.xlu0 %v663_v6, %s1859_s28  ;;  %v1228_v59 = vadd.f32 %v1226_v52, %v1200_v51  ;;  %v1277_v62 = vmul.f32 %v1272_v27, %v1257_v54  ;;  %v1252_v57 = vmul.f32 %v1250_v24, %v1231_v29  ;;  %s1866_s28 = smov 80   ;;  %v645_v29 = vand.u32 127, %v410_v12 }
 0x1a9   : > { %v1004_v31 = vpop.permute.xlu0 %1003  ;;  %v1253_v60 = vadd.f32 %v1251_v49, %v1227_v53  ;;  %v2251_v0 = vpop.permute.xlu1 %695 }
 0x1aa   : > { %v1024_v35 = vmul.f32 %v1246_v13, %v1004_v31  ;;  %v1025_v47 = vmul.f32 %v1250_v24, %v1004_v31  ;;  %v1254_v61 = vadd.f32 %v1252_v57, %v1228_v59  ;;  %v650_v43 = vand.u32 15, %v645_v29 }
 0x1ab   : > { %v1279_v7 = vadd.f32 %v1277_v62, %v1253_v60 }
 0x1ac   : > { %1067 = vrot.lane.b32.xlu1 %v663_v6, %s1860_s2  ;;  %895 = vrot.lane.b32.xlu0 %v663_v6, %s1861_s29  ;;  %v1026_v3 = vadd.f32 %v1024_v35, %v1000_v8  ;;  %v1027_v55 = vadd.f32 %v1025_v47, %v1001_v50  ;;  %vm2303_vm10 = vcmp.ne.s32.totalorder %v650_v43, 0  ;;  %vm2307_vm11 = vcmp.ne.s32.totalorder %v650_v43, 15 }
 0x1ad   : > { %v2272_v24 = vpop.permute.xlu0 %870 }
 0x1ae   : > { %v1052_v56 = vadd.f32 %v1050_v41, %v1026_v3  ;;  %v1053_v63 = vadd.f32 %v1051_v58, %v1027_v55  ;;  %v2254_v42 = vpop.permute.xlu1 %850 }
 0x1b0   : > { %1294 = vrot.lane.b32.xlu1 %v663_v6, %s1862_s18  ;;  %1122 = vrot.lane.b32.xlu0 %v663_v6, %s1863_s22  ;;  %v1278_v6 = vmul.f32 %v1276_v30, %v1257_v54  ;;  %s1567_s18 = sld [smem:[#allocation3 + $0x6]]  ;;  %s382_s22 = sand.u32 1, %s1824_s10  }
 0x1b1   : > { %s1547_s21 = sshll.u32 %s382_s22, 2 }
 0x1b2   : > { %v1280_v9 = vadd.f32 %v1278_v6, %v1254_v61  ;;  %v2274_v25 = vpop.permute.xlu0 %705  ;;  %s384_s27 = scalar_lea.vmem [#allocation6], %s1547_s21 }
 0x1b3   : > { %v2257_v19 = vpop.permute.xlu1 %860 }
 0x1b4   : > { %826 = vrot.lane.b32.xlu1 %v822_v48, %s1864_s17  ;;  %828 = vrot.lane.b32.xlu0 %v823_v40, %s1864_s17 }
 0x1b6   : > { %v2278_v26 = vpop.permute.xlu0 %880  ;;  %s1411_s17 = ssub.f32 1.0, %s1567_s18 }
 0x1b8   : > { %1056 = vrot.lane.b32.xlu1 %v1052_v56, %s1865_s19  ;;  %1347 = vperm.xlu0 %1708, %v1344_v45   ;;  %v2260_v20 = vpop.permute.xlu1 %905 }
 0x1ba   : > { %v2282_v30 = vpop.permute.xlu0 %1107 }
 0x1bc   : > { %1058 = vrot.lane.b32.xlu1 %v1053_v63, %s1865_s19  ;;  %1355 = vperm.xlu0 %1708, %v1351_v44   ;;  %s1428_s19 = sadd.s32 %s1832_s12, %s1569_s25  ;;  %s1417_s12 = scalar_lea.sflag [#allocation4], %s382_s22 }
 0x1bd   : > { %v2266_v22 = vpop.permute.xlu1 %915  ;;  %s1570_s26 = sshll.u32 %s1428_s19, 6 }
 0x1be   : > { %v2286_v31 = vpop.permute.xlu0 %1334  ;;  %s2391_s0 = scalar_lea.hbm %s2453_s9, %s1570_s26 }
 0x1c0   : > { %1710 = vset.pattern.permute.xlu0 %v1852_v2  ;;  %1283 = vrot.lane.b32.xlu1 %v1279_v7, %s1866_s28  ;;  %v1352_v2 = vld [vmem:[%s2451_s7] sm:$0xf] }
 0x1c1   : > { %1375 = vperm.xlu0 %1710, %v1351_v44  }
 0x1c2   : > { %v2268_v23 = vpop.permute.xlu1 %925 }
 0x1c3   : > { %v2290_v17 = vpop.permute.xlu0 %1077 }
 0x1c4   : > { %1285 = vrot.lane.b32.xlu1 %v1280_v9, %s1866_s28  ;;  %s1432_s28 = sshll.u32 %s384_s27, 4  ;;  %s2393_s28 = int_to_ptr.vmem [resolvable:$true] %s1432_s28 }
 0x1c5   : > { %1713 = vset.pattern.permute.xlu0 %v1851_v1  ;;  %s1750_s13 = scalar_lea.vmem %s2393_s28, 64 }
 0x1c6   : > { %p1751_p11 = scmp.ne.s32.totalorder %s2393_s28, %s1750_s13 }
 0x1c7   : > { %v2270_v13 = vpop.permute.xlu1 %935  ;;  %v2294_v34 = vpop.permute.xlu0 %1132 }
 0x1c8   : > { %1365 = vperm.xlu1 %1709, %v1351_v44   ;;  %p1752_p12 = pnand %p1751_p11, %p1970_p3 }
 0x1ca   : > { %p1753_p13 = pneg %p1752_p12 }
 0x1cb   : > { %v2298_v36 = vpop.permute.xlu0 %1304 }
 0x1cc   : > { %1711 = vset.pattern.permute.xlu1 %v1854_v4  ;;  %v2276_v4 = vpop.permute.xlu1 %1087 }
 0x1cd   : > { %1385 = vperm.xlu1 %1711, %v1351_v44  }
 0x1d1   : > { %1712 = vset.pattern.permute.xlu1 %v1851_v1  ;;  %v2280_v27 = vpop.permute.xlu1 %1097 }
 0x1d2   : > { %1396 = vperm.xlu1 %1712, %v1352_v2  }
 0x1d6   : > { %v2284_v1 = vpop.permute.xlu1 %1142 }
 0x1db   : > { %v2288_v32 = vpop.permute.xlu1 %1152 }
 0x1e0   : > { %v2292_v33 = vpop.permute.xlu1 %1162 }
 0x1e5   : > { %v2296_v35 = vpop.permute.xlu1 %1314 }
 0x1ea   : > { %v2300_v28 = vpop.permute.xlu1 %1324 }
 0x20e   : > { %v839_v10 = vpop.permute.xlu0 %838  ;;  %v665_v11 = vpop.permute.xlu1 %664 }
 0x212   : > { %v1066_v8 = vpop.permute.xlu0 %1065  ;;  %v894_v38 = vpop.permute.xlu1 %893 }
 0x216   : > { %v1293_v46 = vpop.permute.xlu0 %1292  ;;  %v1121_v39 = vpop.permute.xlu1 %1120 }
 0x21a   : > { %v667_v48 = vpop.permute.xlu0 %666  ;;  %v841_v40 = vpop.permute.xlu1 %840 }
 0x21b   : > { %v669_v50 = vsel %vm668_vm8, %v665_v11, %v667_v48  ;;  %v843_v41 = vsel %vm842_vm9, %v839_v10, %v841_v40 }
 0x21c   : > { %v671_v12 = vsel %vm2303_vm10, %v669_v50, 0.0  ;;  %v845_v51 = vsel %vm2307_vm11, %v843_v41, 0.0 }
 0x21d   : > { %v681_v45 = vrot.slane %v671_v12, %v2079_v14  ;;  %v691_v52 = vrot.slane %v671_v12, %v2082_v15  ;;  %v701_v53 = vrot.slane %v671_v12, %v2089_v18  ;;  %v856_v54 = vrot.slane %v845_v51, %v2079_v14 }
 0x21e   : > { %v866_v55 = vrot.slane %v845_v51, %v2082_v15  ;;  %v896_v56 = vpop.permute.xlu0 %895  ;;  %v1068_v49 = vpop.permute.xlu1 %1067  ;;  %v711_v63 = vrot.slane %v671_v12, %v2092_v21  ;;  %v876_v61 = vrot.slane %v845_v51, %v2089_v18  ;;  %v886_v50 = vrot.slane %v845_v51, %v2092_v21 }
 0x21f   : > { %v682_v58 = vmul.f32 %v681_v45, %v2182_v37  ;;  %v692_v44 = vmul.f32 %v691_v52, %v2218_v5  ;;  %v898_v59 = vsel %vm897_vm12, %v894_v38, %v896_v56  ;;  %v1070_v60 = vsel %vm1069_vm13, %v1066_v8, %v1068_v49 }
 0x220   : > { %v900_v62 = vsel %vm2303_vm10, %v898_v59, 0.0  ;;  %v857_v57 = vmul.f32 %v856_v54, %v2254_v42  ;;  %v2329_v6 = vsel %vm2307_vm11, %v1070_v60, 0.0  ;;  %v867_v9 = vmul.f32 %v866_v55, %v2257_v19 }
 0x221   : > { %v693_v7 = vadd.f32 %v692_v44, %v682_v58  ;;  %v911_v2 = vrot.slane %v900_v62, %v2079_v14  ;;  %v921_v10 = vrot.slane %v900_v62, %v2082_v15  ;;  %v702_v11 = vmul.f32 %v701_v53, %v2251_v0 }
 0x222   : > { %v1123_v37 = vpop.permute.xlu0 %1122  ;;  %v1295_v5 = vpop.permute.xlu1 %1294  ;;  %v931_v29 = vrot.slane %v900_v62, %v2089_v18  ;;  %v1083_v42 = vrot.slane %v2329_v6, %v2079_v14  ;;  %v1093_v8 = vrot.slane %v2329_v6, %v2082_v15  ;;  %v712_v40 = vmul.f32 %v711_v63, %v2274_v25 }
 0x223   : > { %v1125_v38 = vsel %vm1124_vm14, %v1121_v39, %v1123_v37  ;;  %v1297_v19 = vsel %vm1296_vm15, %v1293_v46, %v1295_v5  ;;  %v703_v48 = vadd.f32 %v702_v11, %v693_v7  ;;  %v877_v0 = vmul.f32 %v876_v61, %v2272_v24 }
 0x224   : > { %v1127_v43 = vsel %vm2303_vm10, %v1125_v38, 0.0  ;;  %v912_v52 = vmul.f32 %v911_v2, %v2260_v20  ;;  %v922_v39 = vmul.f32 %v921_v10, %v2266_v22  ;;  %v1299_v47 = vsel %vm2307_vm11, %v1297_v19, 0.0 }
 0x225   : > { %v1138_v41 = vrot.slane %v1127_v43, %v2079_v14  ;;  %v1148_v12 = vrot.slane %v1127_v43, %v2082_v15  ;;  %v713_v53 = vadd.f32 %v712_v40, %v703_v48  ;;  %v941_v25 = vrot.slane %v900_v62, %v2092_v21 }
 0x226   : > { %v827_v45 = vpop.permute.xlu1 %826  ;;  %v829_v46 = vpop.permute.xlu0 %828  ;;  %v1084_v24 = vmul.f32 %v1083_v42, %v2290_v17  ;;  %v1094_v51 = vmul.f32 %v1093_v8, %v2276_v4  ;;  %v1103_v54 = vrot.slane %v2329_v6, %v2089_v18  ;;  %v932_v55 = vmul.f32 %v931_v29, %v2268_v23 }
 0x227   : > { %v1139_v20 = vmul.f32 %v1138_v41, %v2294_v34  ;;  %v1149_v22 = vmul.f32 %v1148_v12, %v2284_v1  ;;  %v868_v56 = vadd.f32 %v867_v9, %v857_v57  ;;  %v1158_v3 = vrot.slane %v1127_v43, %v2089_v18 }
 0x228   : > { %v1310_v49 = vrot.slane %v1299_v47, %v2079_v14  ;;  %v1320_v58 = vrot.slane %v1299_v47, %v2082_v15  ;;  %v831_v17 = vsel %vm830_vm0, %v827_v45, %v829_v46  ;;  %v887_v59 = vmul.f32 %v886_v50, %v2278_v26 }
 0x229   : > { %v878_v4 = vadd.f32 %v877_v0, %v868_v56  ;;  %v833_v60 = vadd.f32 %v831_v17, %v713_v53  ;;  %v923_v62 = vadd.f32 %v922_v39, %v912_v52  ;;  %v1104_v23 = vmul.f32 %v1103_v54, %v2280_v27 }
 0x22a   : > { %v1057_v44 = vpop.permute.xlu1 %1056  ;;  %v1113_v1 = vrot.slane %v2329_v6, %v2092_v21  ;;  %v1095_v34 = vadd.f32 %v1094_v51, %v1084_v24  ;;  %v942_v61 = vmul.f32 %v941_v25, %v2270_v13  ;;  %v1150_v37 = vadd.f32 %v1149_v22, %v1139_v20 }
 0x22b   : > { %v888_v63 = vadd.f32 %v887_v59, %v878_v4  ;;  %v933_v57 = vadd.f32 %v932_v55, %v923_v62  ;;  %v1168_v5 = vrot.slane %v1127_v43, %v2092_v21  ;;  %v1311_v7 = vmul.f32 %v1310_v49, %v2298_v36 }
 0x22c   : > { %v1321_v26 = vmul.f32 %v1320_v58, %v2296_v35  ;;  %v1159_v2 = vmul.f32 %v1158_v3, %v2288_v32  ;;  %v1105_v11 = vadd.f32 %v1104_v23, %v1095_v34  ;;  %v1330_v6 = vrot.slane %v1299_v47, %v2089_v18 }
 0x22d   : > { %v889_v27 = vadd.f32 %v888_v63, %v833_v60  ;;  %v943_v10 = vadd.f32 %v942_v61, %v933_v57  ;;  %v1114_v8 = vmul.f32 %v1113_v1, %v2282_v30  ;;  %v1169_v36 = vmul.f32 %v1168_v5, %v2292_v33 }
 0x22e   : > { %v1059_v9 = vpop.permute.xlu1 %1058  ;;  %v1160_v13 = vadd.f32 %v1159_v2, %v1150_v37  ;;  %v1322_v19 = vadd.f32 %v1321_v26, %v1311_v7  ;;  %v1340_v35 = vrot.slane %v1299_v47, %v2092_v21  ;;  %v1331_v32 = vmul.f32 %v1330_v6, %v2300_v28 }
 0x22f   : > { %v1061_v29 = vsel %vm1060_vm1, %v1057_v44, %v1059_v9  ;;  %v944_v42 = vadd.f32 %v943_v10, %v889_v27  ;;  %v1115_v43 = vadd.f32 %v1114_v8, %v1105_v11  ;;  %v1412_v60 = vstv %s1411_s17 }
 0x230   : > { %v1170_v0 = vadd.f32 %v1169_v36, %v1160_v13  ;;  %v1332_v41 = vadd.f32 %v1331_v32, %v1322_v19  ;;  %v1341_v30 = vmul.f32 %v1340_v35, %v2286_v31  ;;  %v1409_v23 = vstv %s1567_s18  ;;  %s1867_s18 = smov [#allocation6]  }
 0x231   : > { %v1063_v48 = vadd.f32 %v1061_v29, %v944_v42  ;;  %v1413_v34 = vmul.f32 %v1412_v60, %v2084_v16  ;;  %s1754_s17 = sshll.u32 %s1867_s18, 4  ;;  %s1755_s17 = int_to_ptr.vmem [resolvable:$false] %s1754_s17 }
 0x232   : > { %v1284_v38 = vpop.permute.xlu1 %1283  ;;  %v1342_v39 = vadd.f32 %v1341_v30, %v1332_v41  ;;  %s1756_s21 = scalar_lea.vmem %s1755_s17, 128  ;;  %p1757_p0 = scmp.lt.s32.totalorder %s2393_s28, %s1755_s17 }
 0x233   : > { %v1116_v40 = vadd.f32 %v1115_v43, %v1063_v48  ;;  %p1758_p1 = scmp.lt.s32.totalorder %s1756_s21, %s1750_s13 }
 0x235   : > { %v1171_v12 = vadd.f32 %v1170_v0, %v1116_v40  ;;  %p1759_p2 = por %p1758_p1, %p1757_p0 }
 0x236   : > { %v1286_v50 = vpop.permute.xlu1 %1285 }
 0x237   : > { %v1288_v45 = vsel %vm1287_vm2, %v1284_v38, %v1286_v50  ;;  %v1348_v46 = vpop.permute.xlu0 %1347  ;;  %p1760_p4 = pnand %p1759_p2, %p1753_p13 }
 0x238   : > { %v1290_v52 = vadd.f32 %v1288_v45, %v1171_v12 }
 0x23a   : > { %v1343_v53 = vadd.f32 %v1342_v39, %v1290_v52 }
 0x23b   : > { %v1356_v24 = vpop.permute.xlu0 %1355 }
 0x23c   : > { %v1350_v25 = vadd.f32 %v1348_v46, %v1343_v53 }
 0x23e   : > { %v1361_v33 = vrot.slane %v1350_v25, %v2079_v14  ;;  %v1381_v47 = vrot.slane %v1350_v25, %v2089_v18  ;;  %v1371_v28 = vrot.slane %v1350_v25, %v2082_v15  ;;  %v1391_v31 = vrot.slane %v1350_v25, %v2092_v21 }
 0x240   : > { %v1376_v51 = vpop.permute.xlu0 %1375  ;;  %v1362_v55 = vmul.f32 %v1361_v33, %v1356_v24 }
 0x241   : > { %v1382_v22 = vmul.f32 %v1381_v47, %v1376_v51 }
 0x247   : > { %v1366_v54 = vpop.permute.xlu1 %1365 }
 0x248   : > { %v1372_v20 = vmul.f32 %v1371_v28, %v1366_v54 }
 0x24a   : > { %v1373_v56 = vadd.f32 %v1372_v20, %v1362_v55 }
 0x24c   : > { %v1386_v3 = vpop.permute.xlu1 %1385  ;;  %v1383_v49 = vadd.f32 %v1382_v22, %v1373_v56 }
 0x24d   : > { %v1392_v58 = vmul.f32 %v1391_v31, %v1386_v3 }
 0x24f   : > { %v1393_v17 = vadd.f32 %v1392_v58, %v1383_v49 }
 0x251   : > { %v1397_v44 = vpop.permute.xlu1 %1396 }
 0x252   : > { %v1399_v14 = vadd.f32 %v1397_v44, %v1393_v17 }
 0x254   : > { %v1400_v18 = vsub.f32 0.0, %v1399_v14 }
 0x256   : > { %v1401_v4 = vmul.f32 1.442695, %v1400_v18 }
 0x258   : > { %1731 = vpow2.f32 %v1401_v4 }
 0x262   : > { %v1732_v15 = vpop.eup %1731 }
 0x263   : > { %v1403_v59 = vadd.f32 1.0, %v1732_v15 }
 0x265   : > { %1733 = vrcp.f32 %v1403_v59 }
 0x26f   : > { %v1734_v21 = vpop.eup %1733 }
 0x270   : > { %v1406_v62 = vmul.f32 %v1734_v21, %v1350_v25 }
 0x272   : > { %v1407_v1 = vmul.f32 %v1406_v62, %v1350_v25 }
 0x274   : > { %v1410_v63 = vmul.f32 %v1409_v23, %v1407_v1 }
 0x276   : > { %v1414_v57 = vadd.f32 %v1413_v34, %v1410_v63 }
 0x278   : > { %1415 = vst [vmem:[%s384_s27] sm:$0xf] %v1414_v57 }
 0x279   : > { %1763 = shalt.err (!%p1760_p4)
}
 0x27a   : > { %s1764_s22 = scalar_lea.hbm %s2391_s0, 64  ;;  %s1768_s26 = scalar_lea.hbm %s2453_s9, 256 }
 0x27b   : > { %p1765_p5 = scmp.ne.s32.totalorder %s2391_s0, %s1764_s22  ;;  %p1769_p9 = scmp.lt.u32.totalorder %s2391_s0, %s2453_s9 }
 0x27c   : > { %p1770_p8 = scmp.lt.u32.totalorder %s1768_s26, %s1764_s22  ;;  %p1772_p11 = scmp.lt.u32.totalorder %s1764_s22, %s2391_s0 }
 0x27d   : > { %p1766_p6 = pnand %p1765_p5, %p1970_p3 }
 0x27e   : > { %p1771_p10 = por %p1770_p8, %p1769_p9 }
 0x27f   : > { %p1767_p7 = pneg %p1766_p6 }
 0x280   : > { %p1773_p12 = por %p1772_p11, %p1771_p10 }
 0x282   : > { %p1774_p13 = pnand %p1773_p12, %p1767_p7 }
 0x284   : > { %1777 = shalt.err (!%p1774_p13)
}
 0x285   : > { %1577 = dma.vmem_to_hbm [thread:$0]  (%p1970_p3), %s2393_s28, 64, %s2391_s0, %s1417_s12  }
 0x286 PF: > { %p1589_p0 = scmp.ge.s32.totalorder %s1848_s16, 2  ;;  %s1444_s29 = sand.u32 1, %s1820_s30  }
 0x287   : > { %p2470_p1 = scmp.ne.s32.totalorder %s2461_s24, 0  ;;  %s1445_s13 = scalar_lea.sflag [#allocation4], %s1444_s29 }
 0x289   : > { %p1584_p2 = pnand %p1589_p0, %p2470_p1 }
 0x28b   : > { %1815 = dma.done.wait (!%p1584_p2), %s1445_s13, 64  }
 0x28c   : > { %1817 = vsyncadd (!%p1584_p2), %s1445_s13, 4294967232  ;;  %s23_s16 = sadd.s32 1, %s1848_s16   ;;  %s2471_s12 = sld [smem:[#allocation9_spill]] }
 0x28d   : > { %p20_p4 = scmp.ge.s32.totalorder %s23_s16, 6   ;;  %s2472_s0 = sld [smem:[#allocation10_spill]] }
 0x28e   : > { %s2473_s30 = smov %s1824_s10  ;;  %s2474_s10 = smov %s1828_s11 }
 0x28f   : > { %s2475_s11 = smov %s2000_s14  ;;  %s2476_s13 = smov %s1844_s15 }
 0x290   : > { %s2478_s15 = smov %s2484_s20  ;;  %22 = sbr.rel (!%p20_p4) target bundleno = 9 (0x9), region = 109 }
 0x293   : > { %s2477_s14 = smov %s2472_s0 }
 0x297   :  { %1450 = vsyncpa [#allocation4], 1 }
 0x298   :  { %1452 = vsyncpa [#allocation4 + $0x1], 1 }
 0x299   :  { %1453 = vsyncpa [#allocation5], 1 }
 0x29a   :  { %1455 = vsyncpa [#allocation5 + $0x1], 1 }

</bundles_post_ra>
